<compile_context>
chip_gen: v7x
topology: tpu7x:2x2x1
jax: 0.10.0
libtpu: 0.0.40
codegen_flags: <defaults>
</compile_context>

<pallas_src>
import jax
import jax.numpy as jnp
import numpy as np
from jax import lax
from jax.experimental import pallas as pl
from jax.experimental.pallas import tpu as pltpu

NEG_FILL = -1e9  # value used by masked_fill in the reference module


def light_attention_kernel(x_ref, mask_ref, w_ref, b_ref, o_ref, acc_ref):
    # x_ref:    [L, E]       bf16  one sequence (channels on lanes)
    # mask_ref: [L, 1]       f32   1.0 where valid, 0.0 where padded
    # w_ref:    [K, E, 2*TN] bf16  fused [feature | attention] conv weights for this channel tile
    # b_ref:    [1, TN]      f32   feature-conv bias for this tile (attention bias folded out)
    # o_ref:    [2, TN]      f32   row 0 = attention-pooled, row 1 = max-pooled
    # acc_ref:  [L, 2*TN]    f32   scratch conv accumulator
    L = x_ref.shape[0]
    K = w_ref.shape[0]
    TN2 = w_ref.shape[2]
    TN = TN2 // 2
    pad = K // 2

    acc_ref[...] = jnp.zeros_like(acc_ref)

    # Conv1d(padding='same', stride=1) for both convs at once: K shifted bf16 MXU matmuls with
    # f32 accumulation.  Boundary taps use clamped (static) row ranges instead of a zero-padded
    # input copy -- the 'same' padding never exists in memory.
    for k in range(K):
        s = k - pad                  # input-row shift of this tap
        lo = max(0, -s)              # first output row this tap contributes to
        hi = min(L, L - s)           # one past the last output row
        rows = hi - lo
        if rows <= 0:                # only possible when L <= K // 2
            continue
        xs = x_ref[lo + s:lo + s + rows, :]                       # [rows, E] bf16 view
        acc_ref[lo:hi, :] += jnp.dot(xs, w_ref[k],
                                     preferred_element_type=jnp.float32)

    feat = acc_ref[:, :TN]           # feature-conv output  (lane-aligned slice)
    attn = acc_ref[:, TN:]           # attention-conv output

    # attention.masked_fill(mask == False, -1e9)
    valid = mask_ref[...] > 0.0                                   # [L, 1] broadcasts over TN
    attn = jnp.where(valid, attn, NEG_FILL)

    # softmax over the sequence axis + pooling epilogue.
    m = jnp.max(attn, axis=0, keepdims=True)                      # [1, TN]
    e = jnp.exp(attn - m)                                         # [L, TN]
    num = jnp.sum(feat * e, axis=0, keepdims=True)                # [1, TN]
    den = jnp.sum(e, axis=0, keepdims=True)                       # [1, TN]
    b = b_ref[...]                                                # [1, TN]
    o1 = num / den + b               # feature bias re-applied after pooling (softmax sums to 1)
    o2 = jnp.max(feat, axis=0, keepdims=True) + b                 # max-pool over the sequence
    o_ref[...] = jnp.concatenate([o1, o2], axis=0)                # one dense [2, TN] store


def _round_up(v, m):
    return ((v + m - 1) // m) * m


def _vmem_capacity_bytes():
    try:
        return int(pltpu.get_tpu_info().vmem_capacity_bytes)
    except Exception:
        return 64 << 20              # conservative fallback (v7x per-TensorCore VMEM)


def _estimate_vmem_bytes(L, Ep, TN, K):
    """Rough per-step VMEM footprint for a candidate channel tile TN."""
    tn2 = 2 * TN
    w_tile = K * Ep * tn2 * 2                         # bf16 fused weight tile
    w_bufs = 1 if w_tile >= (4 << 20) else 2          # large tiles get Buffered(1)
    return (w_bufs * w_tile
            + 2 * L * Ep * 2                          # x block, bf16, double-buffered
            + 2 * L * 128 * 4                         # mask block (lane-padded), double-buffered
            + 2 * 2 * TN * 4                          # output block, double-buffered
            + L * tn2 * 4                             # acc scratch (f32)
            + 4 * L * TN * 4)                         # live f32 epilogue temporaries


def _pick_channel_tile(Ep, L, K, budget):
    """Largest 128-multiple divisor of Ep whose estimated footprint fits the VMEM budget."""
    cands = [t for t in range(Ep, 127, -128) if Ep % t == 0]
    for tn in cands:
        if _estimate_vmem_bytes(L, Ep, tn, K) <= budget:
            return tn
    # TODO(synk): for extremely long sequences even TN=128 may not fit; needs L-chunking.
    return cands[-1]


def light_attention_pallas(x, mask, w_feat, b_feat, w_attn, b_attn):
    """x: [B, L, E] (f32 or bf16, as passed to forward before the permute),
    mask: [B, 1, L] bool.  w_*: [E, E, K] (PyTorch Conv1d [out, in, k]), b_*: [E].
    Returns [B, 2E] float32 == cat([o1, o2], dim=-1)."""
    B, L, E = x.shape
    K = w_feat.shape[-1]
    Ep = _round_up(max(E, 128), 128)                  # lane-dense channel count

    # ---- chip-aware tiling ----
    vmem_cap = _vmem_capacity_bytes()
    budget = max(16 << 20, min(int(vmem_cap * 0.85), vmem_cap - (8 << 20)))
    TN = _pick_channel_tile(Ep, L, K, budget)
    nc = Ep // TN

    # ---- operand prep (x: only a cast, no-op for bf16 callers; tiny mask/weight reshuffles) ----
    x_k = x.astype(jnp.bfloat16)
    if Ep != E:
        x_k = jnp.pad(x_k, ((0, 0), (0, 0), (0, Ep - E)))
    mask_f = jnp.transpose(mask.astype(jnp.float32), (0, 2, 1))          # [B, L, 1]

    def prep_w(w):
        wt = jnp.transpose(w, (2, 1, 0))                                  # [K, in, out]
        if Ep != E:
            wt = jnp.pad(wt, ((0, 0), (0, Ep - E), (0, Ep - E)))
        return wt.reshape(K, Ep, nc, TN)

    # Fused weights [nc, K, Ep, 2*TN]: tile n = [feature cols | attention cols].
    w_fused = jnp.transpose(
        jnp.concatenate([prep_w(w_feat), prep_w(w_attn)], axis=-1),
        (2, 0, 1, 3)).astype(jnp.bfloat16)
    # Only the feature bias is needed: the attention bias cancels in the softmax, and the
    # feature bias is re-applied after pooling inside the kernel (both exact).
    b_pad = jnp.pad(b_feat, (0, Ep - E)) if Ep != E else b_feat
    b_tiles = b_pad.reshape(nc, 1, TN).astype(jnp.float32)

    # ---- BlockSpecs: channel tile OUTER so the weight tile is resident across the batch axis ----
    w_tile_bytes = K * Ep * 2 * TN * 2
    w_kwargs = {}
    if w_tile_bytes >= (4 << 20):
        # Single-buffer the big resident weight tile: it only changes on the outer grid axis,
        # so the default second pipeline buffer would never hold different data.
        w_kwargs = dict(pipeline_mode=pl.Buffered(1))

    grid_spec = pltpu.PrefetchScalarGridSpec(
        num_scalar_prefetch=0,
        grid=(nc, B),
        in_specs=[
            pl.BlockSpec((None, L, Ep), lambda n, b: (b, 0, 0)),               # x (per sequence)
            pl.BlockSpec((None, L, 1), lambda n, b: (b, 0, 0)),                # mask
            pl.BlockSpec((None, K, Ep, 2 * TN), lambda n, b: (n, 0, 0, 0),
                         **w_kwargs),                                          # fused conv weights
            pl.BlockSpec((None, 1, TN), lambda n, b: (n, 0, 0)),               # feature bias
        ],
        out_specs=pl.BlockSpec((None, 2, TN), lambda n, b: (b, 0, n)),
        scratch_shapes=[pltpu.VMEM((L, 2 * TN), jnp.float32)],
    )

    est = _estimate_vmem_bytes(L, Ep, TN, K)
    vmem_limit = int(min(vmem_cap - (8 << 20),
                         max(32 << 20, int(1.4 * est) + (2 << 20))))

    flops = 2 * B * L * K * Ep * (2 * Ep)
    bytes_accessed = int(nc * x_k.size * x_k.dtype.itemsize
                         + nc * mask_f.size * 4
                         + w_fused.size * 2 + b_tiles.size * 4
                         + B * 2 * Ep * 4)

    out3 = pl.pallas_call(
        light_attention_kernel,
        out_shape=jax.ShapeDtypeStruct((B, 2, Ep), jnp.float32),
        grid_spec=grid_spec,
        compiler_params=pltpu.CompilerParams(
            dimension_semantics=("parallel", "parallel"),
            vmem_limit_bytes=vmem_limit),
        cost_estimate=pl.CostEstimate(flops=int(flops),
                                      transcendentals=int(B * L * Ep),
                                      bytes_accessed=bytes_accessed),
    )(x_k, mask_f, w_fused, b_tiles)

    # [B, 2, Ep] -> cat([o1, o2], dim=-1), dropping any channel padding.
    return jnp.concatenate([out3[:, 0, :E], out3[:, 1, :E]], axis=-1)


def light_attention_reference(x, mask, w_feat, b_feat, w_attn, b_attn):
    """Pure-JAX reference mirroring the PyTorch forward (eval mode)."""
    xp = jnp.transpose(x, (0, 2, 1))                  # [B, E, L]  (== x.permute(0, 2, 1))

    def conv1d_same(inp, w, b):
        out = lax.conv_general_dilated(
            inp, w, window_strides=(1,), padding="SAME",
            dimension_numbers=("NCH", "OIH", "NCH"))
        return out + b[None, :, None]

    o = conv1d_same(xp, w_feat, b_feat)               # dropout = identity (eval)
    attn = conv1d_same(xp, w_attn, b_attn)
    attn = jnp.where(mask, attn, NEG_FILL)            # mask [B,1,L] broadcasts over channels
    p = jax.nn.softmax(attn, axis=-1)
    o1 = jnp.sum(o * p, axis=-1)
    o2 = jnp.max(o, axis=-1)
    return jnp.concatenate([o1, o2], axis=-1)


if __name__ == "__main__":
    # Small shapes consistent with the module: batch=2, seq=16, embeddings_dim=32, kernel=9
    B, L, E, K = 2, 16, 32, 9

    key = jax.random.PRNGKey(0)
    kx, kwf, kbf, kwa, kba = jax.random.split(key, 5)

    x = jax.random.normal(kx, (B, L, E), dtype=jnp.float32)
    # mask: [B, 1, L] bool — True for valid tokens, False for padding
    lengths = jnp.array([L, L - 5])
    mask = (jnp.arange(L)[None, None, :] < lengths[:, None, None])

    scale = 1.0 / np.sqrt(E * K)
    w_feat = jax.random.normal(kwf, (E, E, K), dtype=jnp.float32) * scale
    b_feat = jax.random.normal(kbf, (E,), dtype=jnp.float32) * scale
    w_attn = jax.random.normal(kwa, (E, E, K), dtype=jnp.float32) * scale
    b_attn = jax.random.normal(kba, (E,), dtype=jnp.float32) * scale

    out = jax.block_until_ready(
        light_attention_pallas(x, mask, w_feat, b_feat, w_attn, b_attn))
    ref = jax.block_until_ready(
        light_attention_reference(x, mask, w_feat, b_feat, w_attn, b_attn))

    assert out.shape == (B, 2 * E), f"bad output shape {out.shape}"
    # Tolerance accommodates bf16 MXU operands (f32 accumulation).
    np.testing.assert_allclose(np.asarray(out), np.asarray(ref), rtol=3e-2, atol=3e-2)

    print("KERNEL_OK")
</pallas_src>

<mosaic_0001>
module attributes {stable_mosaic.version = 11 : i64} {
  func.func @light_attention_kernel(%arg0: i32, %arg1: i32, %arg2: memref<1x16x128xbf16, #tpu.memory_space<vmem>>, %arg3: memref<1x16x1xf32, #tpu.memory_space<vmem>>, %arg4: memref<1x9x128x256xbf16, #tpu.memory_space<vmem>>, %arg5: memref<1x1x128xf32, #tpu.memory_space<vmem>>, %arg6: memref<1x2x128xf32, #tpu.memory_space<vmem>>, %arg7: memref<16x256xf32, #tpu.memory_space<vmem>>) attributes {dimension_semantics = [#tpu.dimension_semantics<parallel>, #tpu.dimension_semantics<parallel>], iteration_bounds = array<i64: 1, 2>, scalar_prefetch = 0 : i64, scratch_operands = 1 : i64, tpu.core_type = #tpu.core_type<tc>, window_params = [{transform_indices = @transform_0, window_bounds = array<i64: 1, 16, 128>}, {transform_indices = @transform_1, window_bounds = array<i64: 1, 16, 1>}, {transform_indices = @transform_2, window_bounds = array<i64: 1, 9, 128, 256>}, {transform_indices = @transform_3, window_bounds = array<i64: 1, 1, 128>}, {transform_indices = @transform_4, window_bounds = array<i64: 1, 2, 128>}]} {
    %cst = arith.constant 0.000000e+00 : f32
    %0 = vector.broadcast %cst : f32 to vector<16x256xf32>
    %c0 = arith.constant 0 : index
    %c0_0 = arith.constant 0 : index
    %1 = vector.load %arg7[%c0, %c0_0] : memref<16x256xf32, #tpu.memory_space<vmem>>, vector<16x256xf32>
    tpu.vector_store %arg7[%c0, %c0_0], %0 {strides = array<i32>} : memref<16x256xf32, #tpu.memory_space<vmem>>, vector<16x256xf32>,
    %c0_1 = arith.constant 0 : index
    %c0_2 = arith.constant 0 : index
    %c0_3 = arith.constant 0 : index
    %2 = vector.load %arg2[%c0_1, %c0_2, %c0_3] : memref<1x16x128xbf16, #tpu.memory_space<vmem>>, vector<1x12x128xbf16>
    %3 = vector.shape_cast %2 : vector<1x12x128xbf16> to vector<12x128xbf16>
    %c4 = arith.constant 4 : index
    %c0_4 = arith.constant 0 : index
    %4 = vector.load %arg7[%c4, %c0_4] : memref<16x256xf32, #tpu.memory_space<vmem>>, vector<12x256xf32>
    %c0_5 = arith.constant 0 : index
    %c0_6 = arith.constant 0 : index
    %c0_7 = arith.constant 0 : index
    %c0_8 = arith.constant 0 : index
    %5 = vector.load %arg4[%c0_5, %c0_6, %c0_7, %c0_8] : memref<1x9x128x256xbf16, #tpu.memory_space<vmem>>, vector<1x1x128x256xbf16>
    %6 = vector.shape_cast %5 : vector<1x1x128x256xbf16> to vector<128x256xbf16>
    %cst_9 = arith.constant dense<0.000000e+00> : vector<12x256xf32>
    %7 = tpu.matmul %3, %6, %cst_9 {dimension_numbers = #tpu.dot_dimension_numbers<[1], [0], [0], [1], [0, 0, 1, 1], [], []>} : vector<12x128xbf16>, vector<128x256xbf16>, vector<12x256xf32> -> vector<12x256xf32>
    %8 = arith.addf %4, %7 : vector<12x256xf32>
    %c4_10 = arith.constant 4 : index
    %c0_11 = arith.constant 0 : index
    %9 = vector.load %arg7[%c4_10, %c0_11] : memref<16x256xf32, #tpu.memory_space<vmem>>, vector<12x256xf32>
    tpu.vector_store %arg7[%c4_10, %c0_11], %8 {strides = array<i32>} : memref<16x256xf32, #tpu.memory_space<vmem>>, vector<12x256xf32>,
    %c0_12 = arith.constant 0 : index
    %c0_13 = arith.constant 0 : index
    %c0_14 = arith.constant 0 : index
    %10 = vector.load %arg2[%c0_12, %c0_13, %c0_14] : memref<1x16x128xbf16, #tpu.memory_space<vmem>>, vector<1x13x128xbf16>
    %11 = vector.shape_cast %10 : vector<1x13x128xbf16> to vector<13x128xbf16>
    %c3 = arith.constant 3 : index
    %c0_15 = arith.constant 0 : index
    %12 = vector.load %arg7[%c3, %c0_15] : memref<16x256xf32, #tpu.memory_space<vmem>>, vector<13x256xf32>
    %c0_16 = arith.constant 0 : index
    %c1 = arith.constant 1 : index
    %c0_17 = arith.constant 0 : index
    %c0_18 = arith.constant 0 : index
    %13 = vector.load %arg4[%c0_16, %c1, %c0_17, %c0_18] : memref<1x9x128x256xbf16, #tpu.memory_space<vmem>>, vector<1x1x128x256xbf16>
    %14 = vector.shape_cast %13 : vector<1x1x128x256xbf16> to vector<128x256xbf16>
    %cst_19 = arith.constant dense<0.000000e+00> : vector<13x256xf32>
    %15 = tpu.matmul %11, %14, %cst_19 {dimension_numbers = #tpu.dot_dimension_numbers<[1], [0], [0], [1], [0, 0, 1, 1], [], []>} : vector<13x128xbf16>, vector<128x256xbf16>, vector<13x256xf32> -> vector<13x256xf32>
    %16 = arith.addf %12, %15 : vector<13x256xf32>
    %c3_20 = arith.constant 3 : index
    %c0_21 = arith.constant 0 : index
    %17 = vector.load %arg7[%c3_20, %c0_21] : memref<16x256xf32, #tpu.memory_space<vmem>>, vector<13x256xf32>
    tpu.vector_store %arg7[%c3_20, %c0_21], %16 {strides = array<i32>} : memref<16x256xf32, #tpu.memory_space<vmem>>, vector<13x256xf32>,
    %c0_22 = arith.constant 0 : index
    %c0_23 = arith.constant 0 : index
    %c0_24 = arith.constant 0 : index
    %18 = vector.load %arg2[%c0_22, %c0_23, %c0_24] : memref<1x16x128xbf16, #tpu.memory_space<vmem>>, vector<1x14x128xbf16>
    %19 = vector.shape_cast %18 : vector<1x14x128xbf16> to vector<14x128xbf16>
    %c2 = arith.constant 2 : index
    %c0_25 = arith.constant 0 : index
    %20 = vector.load %arg7[%c2, %c0_25] : memref<16x256xf32, #tpu.memory_space<vmem>>, vector<14x256xf32>
    %c0_26 = arith.constant 0 : index
    %c2_27 = arith.constant 2 : index
    %c0_28 = arith.constant 0 : index
    %c0_29 = arith.constant 0 : index
    %21 = vector.load %arg4[%c0_26, %c2_27, %c0_28, %c0_29] : memref<1x9x128x256xbf16, #tpu.memory_space<vmem>>, vector<1x1x128x256xbf16>
    %22 = vector.shape_cast %21 : vector<1x1x128x256xbf16> to vector<128x256xbf16>
    %cst_30 = arith.constant dense<0.000000e+00> : vector<14x256xf32>
    %23 = tpu.matmul %19, %22, %cst_30 {dimension_numbers = #tpu.dot_dimension_numbers<[1], [0], [0], [1], [0, 0, 1, 1], [], []>} : vector<14x128xbf16>, vector<128x256xbf16>, vector<14x256xf32> -> vector<14x256xf32>
    %24 = arith.addf %20, %23 : vector<14x256xf32>
    %c2_31 = arith.constant 2 : index
    %c0_32 = arith.constant 0 : index
    %25 = vector.load %arg7[%c2_31, %c0_32] : memref<16x256xf32, #tpu.memory_space<vmem>>, vector<14x256xf32>
    tpu.vector_store %arg7[%c2_31, %c0_32], %24 {strides = array<i32>} : memref<16x256xf32, #tpu.memory_space<vmem>>, vector<14x256xf32>,
    %c0_33 = arith.constant 0 : index
    %c0_34 = arith.constant 0 : index
    %c0_35 = arith.constant 0 : index
    %26 = vector.load %arg2[%c0_33, %c0_34, %c0_35] : memref<1x16x128xbf16, #tpu.memory_space<vmem>>, vector<1x15x128xbf16>
    %27 = vector.shape_cast %26 : vector<1x15x128xbf16> to vector<15x128xbf16>
    %c1_36 = arith.constant 1 : index
    %c0_37 = arith.constant 0 : index
    %28 = vector.load %arg7[%c1_36, %c0_37] : memref<16x256xf32, #tpu.memory_space<vmem>>, vector<15x256xf32>
    %c0_38 = arith.constant 0 : index
    %c3_39 = arith.constant 3 : index
    %c0_40 = arith.constant 0 : index
    %c0_41 = arith.constant 0 : index
    %29 = vector.load %arg4[%c0_38, %c3_39, %c0_40, %c0_41] : memref<1x9x128x256xbf16, #tpu.memory_space<vmem>>, vector<1x1x128x256xbf16>
    %30 = vector.shape_cast %29 : vector<1x1x128x256xbf16> to vector<128x256xbf16>
    %cst_42 = arith.constant dense<0.000000e+00> : vector<15x256xf32>
    %31 = tpu.matmul %27, %30, %cst_42 {dimension_numbers = #tpu.dot_dimension_numbers<[1], [0], [0], [1], [0, 0, 1, 1], [], []>} : vector<15x128xbf16>, vector<128x256xbf16>, vector<15x256xf32> -> vector<15x256xf32>
    %32 = arith.addf %28, %31 : vector<15x256xf32>
    %c1_43 = arith.constant 1 : index
    %c0_44 = arith.constant 0 : index
    %33 = vector.load %arg7[%c1_43, %c0_44] : memref<16x256xf32, #tpu.memory_space<vmem>>, vector<15x256xf32>
    tpu.vector_store %arg7[%c1_43, %c0_44], %32 {strides = array<i32>} : memref<16x256xf32, #tpu.memory_space<vmem>>, vector<15x256xf32>,
    %c0_45 = arith.constant 0 : index
    %c0_46 = arith.constant 0 : index
    %c0_47 = arith.constant 0 : index
    %34 = vector.load %arg2[%c0_45, %c0_46, %c0_47] : memref<1x16x128xbf16, #tpu.memory_space<vmem>>, vector<1x16x128xbf16>
    %35 = vector.shape_cast %34 : vector<1x16x128xbf16> to vector<16x128xbf16>
    %c0_48 = arith.constant 0 : index
    %c0_49 = arith.constant 0 : index
    %36 = vector.load %arg7[%c0_48, %c0_49] : memref<16x256xf32, #tpu.memory_space<vmem>>, vector<16x256xf32>
    %c0_50 = arith.constant 0 : index
    %c4_51 = arith.constant 4 : index
    %c0_52 = arith.constant 0 : index
    %c0_53 = arith.constant 0 : index
    %37 = vector.load %arg4[%c0_50, %c4_51, %c0_52, %c0_53] : memref<1x9x128x256xbf16, #tpu.memory_space<vmem>>, vector<1x1x128x256xbf16>
    %38 = vector.shape_cast %37 : vector<1x1x128x256xbf16> to vector<128x256xbf16>
    %cst_54 = arith.constant dense<0.000000e+00> : vector<16x256xf32>
    %39 = tpu.matmul %35, %38, %cst_54 {dimension_numbers = #tpu.dot_dimension_numbers<[1], [0], [0], [1], [0, 0, 1, 1], [], []>} : vector<16x128xbf16>, vector<128x256xbf16>, vector<16x256xf32> -> vector<16x256xf32>
    %40 = arith.addf %36, %39 : vector<16x256xf32>
    %c0_55 = arith.constant 0 : index
    %c0_56 = arith.constant 0 : index
    %41 = vector.load %arg7[%c0_55, %c0_56] : memref<16x256xf32, #tpu.memory_space<vmem>>, vector<16x256xf32>
    tpu.vector_store %arg7[%c0_55, %c0_56], %40 {strides = array<i32>} : memref<16x256xf32, #tpu.memory_space<vmem>>, vector<16x256xf32>,
    %c0_57 = arith.constant 0 : index
    %c1_58 = arith.constant 1 : index
    %c0_59 = arith.constant 0 : index
    %42 = vector.load %arg2[%c0_57, %c1_58, %c0_59] : memref<1x16x128xbf16, #tpu.memory_space<vmem>>, vector<1x15x128xbf16>
    %43 = vector.shape_cast %42 : vector<1x15x128xbf16> to vector<15x128xbf16>
    %c0_60 = arith.constant 0 : index
    %c0_61 = arith.constant 0 : index
    %44 = vector.load %arg7[%c0_60, %c0_61] : memref<16x256xf32, #tpu.memory_space<vmem>>, vector<15x256xf32>
    %c0_62 = arith.constant 0 : index
    %c5 = arith.constant 5 : index
    %c0_63 = arith.constant 0 : index
    %c0_64 = arith.constant 0 : index
    %45 = vector.load %arg4[%c0_62, %c5, %c0_63, %c0_64] : memref<1x9x128x256xbf16, #tpu.memory_space<vmem>>, vector<1x1x128x256xbf16>
    %46 = vector.shape_cast %45 : vector<1x1x128x256xbf16> to vector<128x256xbf16>
    %cst_65 = arith.constant dense<0.000000e+00> : vector<15x256xf32>
    %47 = tpu.matmul %43, %46, %cst_65 {dimension_numbers = #tpu.dot_dimension_numbers<[1], [0], [0], [1], [0, 0, 1, 1], [], []>} : vector<15x128xbf16>, vector<128x256xbf16>, vector<15x256xf32> -> vector<15x256xf32>
    %48 = arith.addf %44, %47 : vector<15x256xf32>
    %c0_66 = arith.constant 0 : index
    %c0_67 = arith.constant 0 : index
    %49 = vector.load %arg7[%c0_66, %c0_67] : memref<16x256xf32, #tpu.memory_space<vmem>>, vector<15x256xf32>
    tpu.vector_store %arg7[%c0_66, %c0_67], %48 {strides = array<i32>} : memref<16x256xf32, #tpu.memory_space<vmem>>, vector<15x256xf32>,
    %c0_68 = arith.constant 0 : index
    %c2_69 = arith.constant 2 : index
    %c0_70 = arith.constant 0 : index
    %50 = vector.load %arg2[%c0_68, %c2_69, %c0_70] : memref<1x16x128xbf16, #tpu.memory_space<vmem>>, vector<1x14x128xbf16>
    %51 = vector.shape_cast %50 : vector<1x14x128xbf16> to vector<14x128xbf16>
    %c0_71 = arith.constant 0 : index
    %c0_72 = arith.constant 0 : index
    %52 = vector.load %arg7[%c0_71, %c0_72] : memref<16x256xf32, #tpu.memory_space<vmem>>, vector<14x256xf32>
    %c0_73 = arith.constant 0 : index
    %c6 = arith.constant 6 : index
    %c0_74 = arith.constant 0 : index
    %c0_75 = arith.constant 0 : index
    %53 = vector.load %arg4[%c0_73, %c6, %c0_74, %c0_75] : memref<1x9x128x256xbf16, #tpu.memory_space<vmem>>, vector<1x1x128x256xbf16>
    %54 = vector.shape_cast %53 : vector<1x1x128x256xbf16> to vector<128x256xbf16>
    %cst_76 = arith.constant dense<0.000000e+00> : vector<14x256xf32>
    %55 = tpu.matmul %51, %54, %cst_76 {dimension_numbers = #tpu.dot_dimension_numbers<[1], [0], [0], [1], [0, 0, 1, 1], [], []>} : vector<14x128xbf16>, vector<128x256xbf16>, vector<14x256xf32> -> vector<14x256xf32>
    %56 = arith.addf %52, %55 : vector<14x256xf32>
    %c0_77 = arith.constant 0 : index
    %c0_78 = arith.constant 0 : index
    %57 = vector.load %arg7[%c0_77, %c0_78] : memref<16x256xf32, #tpu.memory_space<vmem>>, vector<14x256xf32>
    tpu.vector_store %arg7[%c0_77, %c0_78], %56 {strides = array<i32>} : memref<16x256xf32, #tpu.memory_space<vmem>>, vector<14x256xf32>,
    %c0_79 = arith.constant 0 : index
    %c3_80 = arith.constant 3 : index
    %c0_81 = arith.constant 0 : index
    %58 = vector.load %arg2[%c0_79, %c3_80, %c0_81] : memref<1x16x128xbf16, #tpu.memory_space<vmem>>, vector<1x13x128xbf16>
    %59 = vector.shape_cast %58 : vector<1x13x128xbf16> to vector<13x128xbf16>
    %c0_82 = arith.constant 0 : index
    %c0_83 = arith.constant 0 : index
    %60 = vector.load %arg7[%c0_82, %c0_83] : memref<16x256xf32, #tpu.memory_space<vmem>>, vector<13x256xf32>
    %c0_84 = arith.constant 0 : index
    %c7 = arith.constant 7 : index
    %c0_85 = arith.constant 0 : index
    %c0_86 = arith.constant 0 : index
    %61 = vector.load %arg4[%c0_84, %c7, %c0_85, %c0_86] : memref<1x9x128x256xbf16, #tpu.memory_space<vmem>>, vector<1x1x128x256xbf16>
    %62 = vector.shape_cast %61 : vector<1x1x128x256xbf16> to vector<128x256xbf16>
    %cst_87 = arith.constant dense<0.000000e+00> : vector<13x256xf32>
    %63 = tpu.matmul %59, %62, %cst_87 {dimension_numbers = #tpu.dot_dimension_numbers<[1], [0], [0], [1], [0, 0, 1, 1], [], []>} : vector<13x128xbf16>, vector<128x256xbf16>, vector<13x256xf32> -> vector<13x256xf32>
    %64 = arith.addf %60, %63 : vector<13x256xf32>
    %c0_88 = arith.constant 0 : index
    %c0_89 = arith.constant 0 : index
    %65 = vector.load %arg7[%c0_88, %c0_89] : memref<16x256xf32, #tpu.memory_space<vmem>>, vector<13x256xf32>
    tpu.vector_store %arg7[%c0_88, %c0_89], %64 {strides = array<i32>} : memref<16x256xf32, #tpu.memory_space<vmem>>, vector<13x256xf32>,
    %c0_90 = arith.constant 0 : index
    %c4_91 = arith.constant 4 : index
    %c0_92 = arith.constant 0 : index
    %66 = vector.load %arg2[%c0_90, %c4_91, %c0_92] : memref<1x16x128xbf16, #tpu.memory_space<vmem>>, vector<1x12x128xbf16>
    %67 = vector.shape_cast %66 : vector<1x12x128xbf16> to vector<12x128xbf16>
    %c0_93 = arith.constant 0 : index
    %c0_94 = arith.constant 0 : index
    %68 = vector.load %arg7[%c0_93, %c0_94] : memref<16x256xf32, #tpu.memory_space<vmem>>, vector<12x256xf32>
    %c0_95 = arith.constant 0 : index
    %c8 = arith.constant 8 : index
    %c0_96 = arith.constant 0 : index
    %c0_97 = arith.constant 0 : index
    %69 = vector.load %arg4[%c0_95, %c8, %c0_96, %c0_97] : memref<1x9x128x256xbf16, #tpu.memory_space<vmem>>, vector<1x1x128x256xbf16>
    %70 = vector.shape_cast %69 : vector<1x1x128x256xbf16> to vector<128x256xbf16>
    %cst_98 = arith.constant dense<0.000000e+00> : vector<12x256xf32>
    %71 = tpu.matmul %67, %70, %cst_98 {dimension_numbers = #tpu.dot_dimension_numbers<[1], [0], [0], [1], [0, 0, 1, 1], [], []>} : vector<12x128xbf16>, vector<128x256xbf16>, vector<12x256xf32> -> vector<12x256xf32>
    %72 = arith.addf %68, %71 : vector<12x256xf32>
    %c0_99 = arith.constant 0 : index
    %c0_100 = arith.constant 0 : index
    %73 = vector.load %arg7[%c0_99, %c0_100] : memref<16x256xf32, #tpu.memory_space<vmem>>, vector<12x256xf32>
    tpu.vector_store %arg7[%c0_99, %c0_100], %72 {strides = array<i32>} : memref<16x256xf32, #tpu.memory_space<vmem>>, vector<12x256xf32>,
    %c0_101 = arith.constant 0 : index
    %c0_102 = arith.constant 0 : index
    %74 = vector.load %arg7[%c0_101, %c0_102] : memref<16x256xf32, #tpu.memory_space<vmem>>, vector<16x128xf32>
    %c0_103 = arith.constant 0 : index
    %c128 = arith.constant 128 : index
    %75 = vector.load %arg7[%c0_103, %c128] : memref<16x256xf32, #tpu.memory_space<vmem>>, vector<16x128xf32>
    %c0_104 = arith.constant 0 : index
    %c0_105 = arith.constant 0 : index
    %c0_106 = arith.constant 0 : index
    %76 = vector.load %arg3[%c0_104, %c0_105, %c0_106] : memref<1x16x1xf32, #tpu.memory_space<vmem>>, vector<1x16x1xf32>
    %77 = vector.shape_cast %76 : vector<1x16x1xf32> to vector<16x1xf32>
    %cst_107 = arith.constant 0.000000e+00 : f32
    %78 = vector.broadcast %cst_107 : f32 to vector<16x1xf32>
    %79 = arith.cmpf ogt, %77, %78 : vector<16x1xf32>
    %cst_108 = arith.constant -1.000000e+09 : f32
    %80 = vector.shape_cast %79 : vector<16x1xi1> to vector<16x1xi1>
    %81 = vector.broadcast %80 : vector<16x1xi1> to vector<16x128xi1>
    %82 = vector.broadcast %cst_108 : f32 to vector<16x128xf32>
    %83 = arith.select %81, %75, %82 : vector<16x128xi1>, vector<16x128xf32>
    %cst_109 = arith.constant dense<0xFF800000> : vector<128xf32>
    %84 = vector.multi_reduction <maximumf>, %83, %cst_109 [0] : vector<16x128xf32> to vector<128xf32>
    %85 = vector.shape_cast %84 : vector<128xf32> to vector<1x128xf32>
    %86 = vector.broadcast %85 : vector<1x128xf32> to vector<16x128xf32>
    %87 = arith.subf %83, %86 : vector<16x128xf32>
    %88 = math.exp %87 : vector<16x128xf32>
    %89 = arith.mulf %74, %88 : vector<16x128xf32>
    %cst_110 = arith.constant dense<0.000000e+00> : vector<128xf32>
    %90 = vector.multi_reduction <add>, %89, %cst_110 [0] : vector<16x128xf32> to vector<128xf32>
    %91 = vector.shape_cast %90 : vector<128xf32> to vector<1x128xf32>
    %cst_111 = arith.constant dense<0.000000e+00> : vector<128xf32>
    %92 = vector.multi_reduction <add>, %88, %cst_111 [0] : vector<16x128xf32> to vector<128xf32>
    %93 = vector.shape_cast %92 : vector<128xf32> to vector<1x128xf32>
    %c0_112 = arith.constant 0 : index
    %c0_113 = arith.constant 0 : index
    %c0_114 = arith.constant 0 : index
    %94 = vector.load %arg5[%c0_112, %c0_113, %c0_114] : memref<1x1x128xf32, #tpu.memory_space<vmem>>, vector<1x1x128xf32>
    %95 = vector.shape_cast %94 : vector<1x1x128xf32> to vector<1x128xf32>
    %96 = arith.divf %91, %93 : vector<1x128xf32>
    %97 = arith.addf %96, %95 : vector<1x128xf32>
    %cst_115 = arith.constant dense<0xFF800000> : vector<128xf32>
    %98 = vector.multi_reduction <maximumf>, %74, %cst_115 [0] : vector<16x128xf32> to vector<128xf32>
    %99 = vector.shape_cast %98 : vector<128xf32> to vector<1x128xf32>
    %100 = arith.addf %99, %95 : vector<1x128xf32>
    %101 = tpu.concatenate %97, %100 in 0 : vector<1x128xf32>, vector<1x128xf32> -> vector<2x128xf32>
    %c0_116 = arith.constant 0 : index
    %c0_117 = arith.constant 0 : index
    %c0_118 = arith.constant 0 : index
    %102 = vector.load %arg6[%c0_116, %c0_117, %c0_118] : memref<1x2x128xf32, #tpu.memory_space<vmem>>, vector<1x2x128xf32>
    %103 = vector.shape_cast %102 : vector<1x2x128xf32> to vector<2x128xf32>
    %104 = vector.shape_cast %101 : vector<2x128xf32> to vector<1x2x128xf32>
    tpu.vector_store %arg6[%c0_116, %c0_117, %c0_118], %104 {strides = array<i32>} : memref<1x2x128xf32, #tpu.memory_space<vmem>>, vector<1x2x128xf32>,
    return
  }
  func.func @transform_0(%arg0: i32, %arg1: i32) -> (i32, i32, i32) {
    %c0_i32 = arith.constant 0 : i32
    %c0_i32_0 = arith.constant 0 : i32
    %c0_i32_1 = arith.constant 0 : i32
    return %arg1, %c0_i32, %c0_i32_0 : i32, i32, i32
  }
  func.func @transform_1(%arg0: i32, %arg1: i32) -> (i32, i32, i32) {
    %c0_i32 = arith.constant 0 : i32
    %c0_i32_0 = arith.constant 0 : i32
    %c0_i32_1 = arith.constant 0 : i32
    return %arg1, %c0_i32, %c0_i32_0 : i32, i32, i32
  }
  func.func @transform_2(%arg0: i32, %arg1: i32) -> (i32, i32, i32, i32) {
    %c0_i32 = arith.constant 0 : i32
    %c0_i32_0 = arith.constant 0 : i32
    %c0_i32_1 = arith.constant 0 : i32
    %c0_i32_2 = arith.constant 0 : i32
    return %arg0, %c0_i32, %c0_i32_0, %c0_i32_1 : i32, i32, i32, i32
  }
  func.func @transform_3(%arg0: i32, %arg1: i32) -> (i32, i32, i32) {
    %c0_i32 = arith.constant 0 : i32
    %c0_i32_0 = arith.constant 0 : i32
    %c0_i32_1 = arith.constant 0 : i32
    return %arg0, %c0_i32, %c0_i32_0 : i32, i32, i32
  }
  func.func @transform_4(%arg0: i32, %arg1: i32) -> (i32, i32, i32) {
    %c0_i32 = arith.constant 0 : i32
    %c0_i32_0 = arith.constant 0 : i32
    return %arg1, %c0_i32, %arg0 : i32, i32, i32
  }
}

</mosaic_0001>

<bundles_post_ra>
// kernel: tpu_custom_call.1
= control target key start
LH: loop header
LB: loop body
LE: loop exit
PB: predicated region body
PF: predicated region fallthrough
CT: control target
= control target key end

     0   :  { %9 = vsyncpa [#allocation4], 0  ;;  %s2778_s0 = inlined_call_operand.vmem [shape: bf16[2,16,128], index: 0, kind: input, shape index: {}]   ;;  %s2779_s1 = inlined_call_operand.vmem [shape: f32[2,16,1], index: 1, kind: input, shape index: {}]   ;;  %s2780_s2 = inlined_call_operand.hbm [shape: bf16[1,9,128,256], index: 2, kind: input, shape index: {}]   ;;  %s2781_s3 = inlined_call_operand.vmem [shape: f32[1,1,128], index: 3, kind: input, shape index: {}]   ;;  %s2782_s4 = inlined_call_operand.hbm [shape: f32[2,2,128], index: 4, kind: output, shape index: {}]  }
   0x1   :  { %10 = vsyncpa [#allocation5], 0 }
   0x2   :  { %12 = vsyncpa [#allocation5 + $0x1], 0  ;;  %s2592_s15 = smov 0   ;;  %s2594_s16 = smov 0  }
   0x3   :  { %s2596_s17 = smov 0   ;;  %s2598_s18 = smov 0  }
   0x4   :  { %s2600_s19 = smov 0   ;;  %s2602_s20 = smov 0  }
   0x5 LB: > { %s1975_s21 = sadd.s32 4294967295, %s2559_s20   ;;  %s1976_s22 = sadd.s32 4294967294, %s2559_s20   ;;  %s2559_s20 = sphi %s2602_s20, %s18_s20   ;;  %s2555_s19 = sphi %s2600_s19, %s2800_s19   ;;  %s2551_s18 = sphi %s2598_s18, %s2799_s18   ;;  %s2547_s17 = sphi %s2596_s17, %s2798_s17   ;;  %s2543_s16 = sphi %s2594_s16, %s2797_s16   ;;  %s2539_s15 = sphi %s2592_s15, %s2796_s15  }
   0x6   : > { %s27_s23 = sadd.s32 1, %s2555_s19  ;;  %s143_s24 = sadd.s32 1, %s2547_s17 }
   0x7   : > { %p28_p0 = scmp.ge.s32.totalorder %s27_s23, 2  ;;  %p153_p1 = scmp.ne.s32.totalorder %s2547_s17, %s2543_s16 }
   0x8   : > { %p154_p2 = scmp.eq.s32.totalorder %s1975_s21, 1  ;;  %p159_p3 = scmp.ne.s32.totalorder %s2543_s16, %s2539_s15 }
   0x9   : > { %s2802_s23 = smov (%p28_p0, %s27_s23), 0  ;;  %p160_p5 = scmp.eq.s32.totalorder %s1976_s22, 1 }
   0xa   : > { %p2632_p4 = por %p154_p2, %p153_p1  ;;  %s138_s26 = ssub.s32 %s2555_s19, %s2802_s23 }
   0xb   : > { %p1977_p6 = scmp.ge.s32.totalorder %s2559_s20, 1  ;;  %p141_p7 = scmp.eq.s32.totalorder %s138_s26, 0 }
   0xc   : > { %s2787_s25 = scalar_select %p2632_p4, 1, 0 }
   0xd   : > { %p2639_p8 = por %p160_p5, %p159_p3  ;;  %p167_p9 = scmp.lt.s32.totalorder %s2559_s20, 3 }
   0xe   : > { %s2645_s28 = scalar_select %p141_p7, %s2547_s17, %s143_s24  }
   0xf   : > { %s2788_s27 = scalar_select %p2639_p8, 1, 0 }
  0x10   : > { %p2647_p10 = pnand %p1977_p6, %p167_p9  ;;  %p2651_p11 = scmp.eq.s32.totalorder %s1975_s21, 0 }
  0x11   : > { %s2561_s5 = smov [#allocation3]   ;;  %s2449_s10 = scalar_lea.hbm %s2780_s2, 18432 }
  0x12   : > { %s2789_s29 = scalar_select %p2647_p10, 1, 0 }
  0x13   : > { %s2790_s30 = scalar_select %p2651_p11, 1, 0 }
  0x14   : > { %p2153_p12 = pneg %p2647_p10  ;;  %s182_s6 = sshll.u32 %s2561_s5, 4  ;;  %s183_s6 = int_to_ptr.vmem [resolvable:$true] %s182_s6 }
  0x15   : > { %p2450_p0 = scmp.ne.s32.totalorder %s2780_s2, %s2449_s10  ;;  %p2456_p5 = scmp.lt.u32.totalorder %s2449_s10, %s2780_s2 }
  0x16   : > { %p2659_p13 = pnand %p2651_p11, %p2153_p12 }
  0x18   : > { %p2451_p1 = pneg %p2659_p13 }
  0x1a   : > { %p2452_p2 = pnand %p2451_p1, %p2450_p0 }
  0x1c   : > { %p2453_p3 = pneg %p2452_p2 }
  0x1e   : > { %p2458_p6 = pnand %p2456_p5, %p2453_p3 }
  0x20   : > { %2461 = shalt.err (!%p2458_p6)
}
  0x21   : > { %s2462_s21 = scalar_lea.vmem %s183_s6, 18432  ;;  %p2470_p8 = scmp.lt.s32.totalorder %s183_s6, %s183_s6 }
  0x22   : > { %p2463_p7 = scmp.ne.s32.totalorder %s183_s6, %s2462_s21  ;;  %p2471_p4 = scmp.lt.s32.totalorder %s2462_s21, %s2462_s21 }
  0x24   : > { %p2465_p9 = pnand %p2463_p7, %p2451_p1  ;;  %p2472_p11 = por %p2471_p4, %p2470_p8 }
  0x26   : > { %p2466_p12 = pneg %p2465_p9 }
  0x28   : > { %p2473_p10 = pnand %p2472_p11, %p2466_p12 }
  0x2a   : > { %2476 = shalt.err (!%p2473_p10)
}
  0x2b   : > { %s2562_s22 = smov 128   ;;  %s2563_s24 = smov 8  }
  0x2c   : > { %2156 = dma.hbm_to_vmem [thread:$0]  (!%p2659_p13), %s2780_s2, 18432, %s183_s6, [#allocation4], %s2562_s22, %s2562_s22, %s2563_s24  }
  0x2d   : > { %p2792_p0 = scmp.ne.s32.totalorder %s2789_s29, 0 }
  0x2e   : > { %p2793_p2 = scmp.ne.s32.totalorder (!%p2792_p0), %s2790_s30, 0 }
  0x2f   : > { %220 = sbr.rel (%p2792_p0) target bundleno = 517 (0x205), region = 36 }
  0x36   : > { %2530 = dma.done.wait (%p2793_p2), [#allocation4], 18432  }
  0x37   : > { %2532 = vsyncadd (%p2793_p2), [#allocation4], 4294948864  ;;  %v2564_v0 = vmov 0   ;;  %v2218_v1 = vld [vmem:[#allocation3 + $0x4] ss:$8 sps:$4 sm:$0xff]   ;;  %p254_p4 = scmp.lt.s32.totalorder %s2551_s18, 1 }
  0x38   : > { %412 = vmatprep.mubr.bf16.mxu0 %v2564_v0  ;;  %587 = vmatprep.mubr.bf16.mxu1 %v2564_v0  ;;  %v2220_v2 = vld [vmem:[#allocation3] ss:$8 sps:$4 sm:$0xff]   ;;  %v2221_v3 = vld [vmem:[#allocation3 + $0x14] ss:$8 sps:$4 sm:$0xff]   ;;  %v2223_v4 = vld [vmem:[#allocation3 + $0x10] ss:$8 sps:$4 sm:$0xff]  }
  0x39   : > { %2217 = vset.pattern.permute.xlu0 %v2564_v0  ;;  %380 = vmatprep.subr.bf16.mxu0 %v2218_v1  ;;  %v2224_v5 = vld [vmem:[#allocation3 + $0x24] ss:$8 sps:$4 sm:$0xff]   ;;  %v2229_v7 = vld [vmem:[#allocation3 + $0x80] ss:$8 sps:$4 sm:$0xff]   ;;  %v2233_v9 = vld [vmem:[#allocation3 + $0x94] ss:$8 sps:$4 sm:$0xff]  }
  0x3a   : > { %381 = vmatpush1.bf16.msra.mxu0 %v2220_v2  ;;  %v2227_v6 = vld [vmem:[#allocation3 + $0x84] ss:$8 sps:$4 sm:$0xff]   ;;  %v2226_v8 = vld [vmem:[#allocation3 + $0x20] ss:$8 sps:$4 sm:$0xff]   ;;  %v2235_v10 = vld [vmem:[#allocation3 + $0x90] ss:$8 sps:$4 sm:$0xff]  }
  0x3b   : > { %382 = vmatprep.subr.bf16.mxu0 %v2221_v3  ;;  %555 = vmatprep.subr.bf16.mxu1 %v2227_v6  ;;  %v2230_v11 = vld [vmem:[#allocation3 + $0x34] ss:$8 sps:$4 sm:$0xff]   ;;  %v2232_v12 = vld [vmem:[#allocation3 + $0x30] ss:$8 sps:$4 sm:$0xff]   ;;  %v2239_v13 = vld [vmem:[#allocation3 + $0xa4] ss:$8 sps:$4 sm:$0xff]  }
  0x3c   : > { %556 = vmatpush1.bf16.msra.mxu1 %v2229_v7  ;;  %s2690_s29 = scalar_select %p254_p4, %s2551_s18, 1  ;;  %v2236_v14 = vld [vmem:[#allocation3 + $0x44] ss:$8 sps:$4 sm:$0xff]   ;;  %v2241_v15 = vld [vmem:[#allocation3 + $0xa0] ss:$8 sps:$4 sm:$0xff]   ;;  %v2565_v41 = vmov 0.0  }
  0x3d   : > { %557 = vmatprep.subr.bf16.mxu1 %v2233_v9  ;;  %v2245_v16 = vld [vmem:[#allocation3 + $0xb4] ss:$8 sps:$4 sm:$0xff]   ;;  %v2238_v17 = vld [vmem:[#allocation3 + $0x40] ss:$8 sps:$4 sm:$0xff]   ;;  %v2247_v19 = vld [vmem:[#allocation3 + $0xb0] ss:$8 sps:$4 sm:$0xff]  }
  0x3e   : > { %383 = vmatpush1.bf16.msra.mxu0 %v2223_v4  ;;  %s2145_s30 = sshll.u32 %s2690_s29, 3  ;;  %v2242_v18 = vld [vmem:[#allocation3 + $0x54] ss:$8 sps:$4 sm:$0xff]   ;;  %v2251_v20 = vld [vmem:[#allocation3 + $0xc4] ss:$8 sps:$4 sm:$0xff]   ;;  %268 = vst [vmem:[#allocation2] sm:$0xff] %v2565_v41 }
  0x3f   : > { %384 = vmatprep.subr.bf16.mxu0 %v2224_v5  ;;  %s2696_s8 = scalar_lea.vmem %s2778_s0, %s2145_s30  ;;  %v2244_v21 = vld [vmem:[#allocation3 + $0x50] ss:$8 sps:$4 sm:$0xff]   ;;  %v2253_v22 = vld [vmem:[#allocation3 + $0xc0] ss:$8 sps:$4 sm:$0xff]   ;;  %v2248_v23 = vld [vmem:[#allocation3 + $0x64] ss:$8 sps:$4 sm:$0xff]  }
  0x40   : > { %558 = vmatpush1.bf16.msra.mxu1 %v2235_v10  ;;  %v2257_v24 = vld [vmem:[#allocation3 + $0xd4] ss:$8 sps:$4 sm:$0xff]   ;;  %v2250_v25 = vld [vmem:[#allocation3 + $0x60] ss:$8 sps:$4 sm:$0xff]   ;;  %v2259_v26 = vld [vmem:[#allocation3 + $0xd0] ss:$8 sps:$4 sm:$0xff]  }
  0x41   : > { %559 = vmatprep.subr.bf16.mxu1 %v2239_v13  ;;  %v2254_v27 = vld [vmem:[#allocation3 + $0x74] ss:$8 sps:$4 sm:$0xff]   ;;  %v2264_v28 = vld [vmem:[#allocation3 + $0xe4] ss:$8 sps:$4 sm:$0xff]   ;;  %v2256_v29 = vld [vmem:[#allocation3 + $0x70] ss:$8 sps:$4 sm:$0xff]  }
  0x42   : > { %385 = vmatpush1.bf16.msra.mxu0 %v2226_v8  ;;  %v2266_v30 = vld [vmem:[#allocation3 + $0xe0] ss:$8 sps:$4 sm:$0xff]   ;;  %v2263_v31 = vld [vmem:[#allocation3 + $0x104] ss:$8 sps:$4 sm:$0xff]   ;;  %v2270_v32 = vld [vmem:[#allocation3 + $0xf4] ss:$8 sps:$4 sm:$0xff]  }
  0x43   : > { %386 = vmatprep.subr.bf16.mxu0 %v2230_v11  ;;  %v2260_v33 = vld [vmem:[%s2696_s8] sm:$0x3f]   ;;  %v2272_v35 = vld [vmem:[#allocation3 + $0xf0] ss:$8 sps:$4 sm:$0xff]   ;;  %v2269_v36 = vld [vmem:[#allocation3 + $0x114] ss:$8 sps:$4 sm:$0xff]  }
  0x44   : > { %560 = vmatpush1.bf16.msra.mxu1 %v2241_v15  ;;  %v2261_v34 = vld [vmem:[#allocation3 + $0x100] ss:$8 sps:$4 sm:$0xff]   ;;  %v2279_v37 = vld [vmem:[#allocation3 + $0x184] ss:$8 sps:$4 sm:$0xff]   ;;  %v2267_v38 = vld [vmem:[#allocation3 + $0x110] ss:$8 sps:$4 sm:$0xff]  }
  0x45   : > { %561 = vmatprep.subr.bf16.mxu1 %v2245_v16  ;;  %v2276_v39 = vld [vmem:[%s2696_s8] sm:$0x7f]   ;;  %269 = vst [vmem:[#allocation2 + $0x8] sm:$0xff] %v2565_v41  ;;  %v2285_v43 = vld [vmem:[#allocation3 + $0x194] ss:$8 sps:$4 sm:$0xff]   ;;  %s2146_s9 = sshll.u32 %s2690_s29, 4 }
  0x46   : > { %387 = vmatpush1.bf16.msra.mxu0 %v2232_v12  ;;  %v2277_v40 = vld [vmem:[#allocation3 + $0x180] ss:$8 sps:$4 sm:$0xff]   ;;  %v2275_v42 = vld [vmem:[#allocation3 + $0x124] ss:$8 sps:$4 sm:$0xff]   ;;  %v2283_v45 = vld [vmem:[#allocation3 + $0x190] ss:$8 sps:$4 sm:$0xff]   ;;  %s263_s12 = scalar_lea.vmem %s2779_s1, %s2146_s9 }
  0x47   : > { %388 = vmatprep.subr.bf16.mxu0 %v2236_v14  ;;  %v2273_v44 = vld [vmem:[#allocation3 + $0x120] ss:$8 sps:$4 sm:$0xff]   ;;  %v2282_v46 = vld [vmem:[#allocation3 + $0x134] ss:$8 sps:$4 sm:$0xff]   ;;  %v2291_v47 = vld [vmem:[#allocation3 + $0x1a4] ss:$8 sps:$4 sm:$0xff]  }
  0x48   : > { %562 = vmatpush1.bf16.msra.mxu1 %v2247_v19  ;;  %v2280_v48 = vld [vmem:[#allocation3 + $0x130] ss:$8 sps:$4 sm:$0xff]   ;;  %v2288_v49 = vld [vmem:[#allocation3 + $0x144] ss:$8 sps:$4 sm:$0xff]   ;;  %v2289_v50 = vld [vmem:[#allocation3 + $0x1a0] ss:$8 sps:$4 sm:$0xff]  }
  0x49   : > { %563 = vmatprep.subr.bf16.mxu1 %v2251_v20  ;;  %v2297_v51 = vld [vmem:[#allocation3 + $0x1b4] ss:$8 sps:$4 sm:$0xff]   ;;  %v2286_v52 = vld [vmem:[#allocation3 + $0x140] ss:$8 sps:$4 sm:$0xff]   ;;  %v2295_v54 = vld [vmem:[#allocation3 + $0x1b0] ss:$8 sps:$4 sm:$0xff]  }
  0x4a   : > { %389 = vmatpush1.bf16.msra.mxu0 %v2238_v17  ;;  %v2294_v53 = vld [vmem:[#allocation3 + $0x154] ss:$8 sps:$4 sm:$0xff]   ;;  %v2303_v55 = vld [vmem:[#allocation3 + $0x1c4] ss:$8 sps:$4 sm:$0xff]   ;;  %v2292_v56 = vld [vmem:[#allocation3 + $0x150] ss:$8 sps:$4 sm:$0xff]  }
  0x4b   : > { %390 = vmatprep.subr.bf16.mxu0 %v2242_v18  ;;  %v2300_v57 = vld [vmem:[#allocation3 + $0x164] ss:$8 sps:$4 sm:$0xff]   ;;  %v2301_v58 = vld [vmem:[#allocation3 + $0x1c0] ss:$8 sps:$4 sm:$0xff]   ;;  %v2309_v59 = vld [vmem:[#allocation3 + $0x1d4] ss:$8 sps:$4 sm:$0xff]  }
  0x4c   : > { %564 = vmatpush1.bf16.msra.mxu1 %v2253_v22  ;;  %v2298_v60 = vld [vmem:[#allocation3 + $0x160] ss:$8 sps:$4 sm:$0xff]   ;;  %v2306_v61 = vld [vmem:[#allocation3 + $0x174] ss:$8 sps:$4 sm:$0xff]   ;;  %v2307_v62 = vld [vmem:[#allocation3 + $0x1d0] ss:$8 sps:$4 sm:$0xff]  }
  0x4d   : > { %565 = vmatprep.subr.bf16.mxu1 %v2257_v24  ;;  %v2316_v63 = vld [vmem:[#allocation3 + $0x1e4] ss:$8 sps:$4 sm:$0xff]   ;;  %v2304_v1 = vld [vmem:[#allocation3 + $0x170] ss:$8 sps:$4 sm:$0xff]   ;;  %v2314_v3 = vld [vmem:[#allocation3 + $0x1e0] ss:$8 sps:$4 sm:$0xff]  }
  0x4e   : > { %391 = vmatpush1.bf16.msra.mxu0 %v2244_v21  ;;  %v2313_v2 = vld [vmem:[#allocation3 + $0x204] ss:$8 sps:$4 sm:$0xff]   ;;  %v2322_v4 = vld [vmem:[#allocation3 + $0x1f4] ss:$8 sps:$4 sm:$0xff]   ;;  %v2311_v6 = vld [vmem:[#allocation3 + $0x200] ss:$8 sps:$4 sm:$0xff]  }
  0x4f   : > { %392 = vmatprep.subr.bf16.mxu0 %v2248_v23  ;;  %v2310_v5 = vld [vmem:[%s2696_s8] sm:$0x7f]   ;;  %v2319_v7 = vld [vmem:[#allocation3 + $0x214] ss:$8 sps:$4 sm:$0xff]   ;;  %v2320_v8 = vld [vmem:[#allocation3 + $0x1f0] ss:$8 sps:$4 sm:$0xff]  }
  0x50   : > { %566 = vmatpush1.bf16.msra.mxu1 %v2259_v26  ;;  %v2329_v9 = vld [vmem:[#allocation3 + $0x284] ss:$8 sps:$4 sm:$0xff]   ;;  %v2317_v11 = vld [vmem:[#allocation3 + $0x210] ss:$8 sps:$4 sm:$0xff]   ;;  %v2327_v12 = vld [vmem:[#allocation3 + $0x280] ss:$8 sps:$4 sm:$0xff]  }
  0x51   : > { %567 = vmatprep.subr.bf16.mxu1 %v2264_v28  ;;  %v2326_v10 = vld [vmem:[%s2696_s8] sm:$0xff]   ;;  %v2335_v14 = vld [vmem:[#allocation3 + $0x294] ss:$8 sps:$4 sm:$0xff]   ;;  %v2333_v16 = vld [vmem:[#allocation3 + $0x290] ss:$8 sps:$4 sm:$0xff]   ;;  %vm427_vm2 = vcmask 1043456  }
  0x52   : > { %393 = vmatpush1.bf16.msra.mxu0 %v2250_v25  ;;  %v2325_v13 = vld [vmem:[#allocation3 + $0x224] ss:$8 sps:$4 sm:$0xff]   ;;  %v2323_v15 = vld [vmem:[#allocation3 + $0x220] ss:$8 sps:$4 sm:$0xff]   ;;  %v2332_v17 = vld [vmem:[#allocation3 + $0x234] ss:$8 sps:$4 sm:$0xff]  }
  0x53   : > { %394 = vmatprep.subr.bf16.mxu0 %v2254_v27  ;;  %v2341_v18 = vld [vmem:[#allocation3 + $0x2a4] ss:$8 sps:$4 sm:$0xff]   ;;  %v2330_v19 = vld [vmem:[#allocation3 + $0x230] ss:$8 sps:$4 sm:$0xff]   ;;  %v2339_v20 = vld [vmem:[#allocation3 + $0x2a0] ss:$8 sps:$4 sm:$0xff]  }
  0x54   : > { %568 = vmatpush1.bf16.msra.mxu1 %v2266_v30  ;;  %v2338_v21 = vld [vmem:[#allocation3 + $0x244] ss:$8 sps:$4 sm:$0xff]   ;;  %v2347_v22 = vld [vmem:[#allocation3 + $0x2b4] ss:$8 sps:$4 sm:$0xff]   ;;  %v2336_v23 = vld [vmem:[#allocation3 + $0x240] ss:$8 sps:$4 sm:$0xff]  }
  0x55   : > { %569 = vmatprep.subr.bf16.mxu1 %v2270_v32  ;;  %v2345_v24 = vld [vmem:[#allocation3 + $0x2b0] ss:$8 sps:$4 sm:$0xff]   ;;  %v2344_v25 = vld [vmem:[#allocation3 + $0x254] ss:$8 sps:$4 sm:$0xff]   ;;  %v2353_v26 = vld [vmem:[#allocation3 + $0x2c4] ss:$8 sps:$4 sm:$0xff]  }
  0x56   : > { %395 = vmatpush1.bf16.msra.mxu0 %v2256_v29  ;;  %v2342_v27 = vld [vmem:[#allocation3 + $0x250] ss:$8 sps:$4 sm:$0xff]   ;;  %v2351_v28 = vld [vmem:[#allocation3 + $0x2c0] ss:$8 sps:$4 sm:$0xff]   ;;  %v2350_v29 = vld [vmem:[#allocation3 + $0x264] ss:$8 sps:$4 sm:$0xff]  }
  0x57   : > { %730 = vmatprep.subr.bf16.mxu0 %v2263_v31  ;;  %v2359_v30 = vld [vmem:[#allocation3 + $0x2d4] ss:$8 sps:$4 sm:$0xff]   ;;  %v2348_v31 = vld [vmem:[#allocation3 + $0x260] ss:$8 sps:$4 sm:$0xff]   ;;  %vm602_vm3 = vcmask 1042432   ;;  %vm777_vm4 = vcmask 1041408  }
  0x58   : > { %570 = vmatpush1.bf16.msra.mxu1 %v2272_v35  ;;  %v2376_v32 = vld [vmem:[%s2696_s8] sm:$0xff]   ;;  %vm952_vm5 = vcmask 1040384   ;;  %s251_s13 = sand.u32 1, %s2543_s16   ;;  %s2142_s24 = sshll.u32 %s2551_s18, 5 }
  0x59   : > { %413 = vmatmul.mubr.bf16.vlgmr.msra.gmra.mrb[0].mxu0 %v2260_v33  ;;  %905 = vmatprep.subr.bf16.mxu1 %v2279_v37  ;;  %v2357_v33 = vld [vmem:[#allocation3 + $0x2d0] ss:$8 sps:$4 sm:$0xff]   ;;  %v2366_v35 = vld [vmem:[#allocation3 + $0x2e4] ss:$8 sps:$4 sm:$0xff]   ;;  %v2361_v41 = vld [vmem:[#allocation3 + $0x300] ss:$8 sps:$4 sm:$0xff]   ;;  %s2730_s6 = scalar_lea.hbm %s2782_s4, %s2142_s24 }
  0x5a   : > { %731 = vmatpush1.bf16.msra.mxu0 %v2261_v34  ;;  %762 = vmatprep.mubr.bf16.mxu0 %v2564_v0  ;;  %v2356_v34 = vld [vmem:[#allocation3 + $0x274] ss:$8 sps:$4 sm:$0xff]   ;;  %v2363_v37 = vld [vmem:[#allocation3 + $0x304] ss:$8 sps:$4 sm:$0xff]   ;;  %s1983_s14 = sshll.u32 %s251_s13, 1  ;;  %s1855_s7 = scalar_lea.sflag [#allocation5], %s251_s13 }
  0x5b   : > { %732 = vmatprep.subr.bf16.mxu0 %v2269_v36  ;;  %588 = vmatmul.mubr.bf16.vlgmr.msra.gmra.mrb[0].mxu1 %v2276_v39  ;;  %v2354_v36 = vld [vmem:[#allocation3 + $0x270] ss:$8 sps:$4 sm:$0xff]   ;;  %v2364_v39 = vld [vmem:[#allocation3 + $0x2e0] ss:$8 sps:$4 sm:$0xff]   ;;  %s253_s26 = scalar_lea.vmem [#allocation6], %s1983_s14  ;;  %p2794_p10 = scmp.ne.s32.totalorder %s2787_s25, 0 }
  0x5c   : > { %906 = vmatpush1.bf16.msra.mxu1 %v2277_v40  ;;  %937 = vmatprep.mubr.bf16.mxu1 %v2564_v0  ;;  %v2372_v40 = vld [vmem:[#allocation3 + $0x2f4] ss:$8 sps:$4 sm:$0xff]   ;;  %s1869_s5 = sshll.u32 %s253_s26, 4  ;;  %s2566_s18 = smov [#allocation6]   ;;  %s2732_s5 = int_to_ptr.vmem [resolvable:$true] %s1869_s5 }
  0x5d   : > { %907 = vmatprep.subr.bf16.mxu1 %v2285_v43  ;;  %v2369_v43 = vld [vmem:[#allocation3 + $0x314] ss:$8 sps:$4 sm:$0xff]   ;;  %s2481_s9 = sshll.u32 %s2566_s18, 4  ;;  %s2482_s9 = int_to_ptr.vmem [resolvable:$false] %s2481_s9 }
  0x5e   : > { %733 = vmatpush1.bf16.msra.mxu0 %v2267_v38  ;;  %v1162_v38 = vshll.u32 %v2376_v32, 16  ;;  %s2483_s10 = scalar_lea.vmem %s2482_s9, 64  ;;  %p2484_p1 = scmp.lt.s32.totalorder %s2732_s5, %s2482_s9 }
  0x5f   : > { %734 = vmatprep.subr.bf16.mxu0 %v2275_v42  ;;  %v2360_v42 = vld [vmem:[%s2696_s8] sm:$0xff]  }
  0x60   : > { %908 = vmatpush1.bf16.msra.mxu1 %v2283_v45  ;;  %v1164_v45 = vrot.slane %v1162_v38, 1  ;;  %v2438_v38 = vld [vmem:[#allocation3 + $0x464] ss:$8 sps:$4 sm:$0xff]  }
  0x61   : > { %909 = vmatprep.subr.bf16.mxu1 %v2291_v47  ;;  %v2379_v47 = vld [vmem:[#allocation3 + $0x384] ss:$8 sps:$4 sm:$0xff]  }
  0x62   : > { %735 = vmatpush1.bf16.msra.mxu0 %v2273_v44  ;;  %v1160_v44 = vshrl.u32 %v2376_v32, 16  ;;  %v2429_v32 = vld [vmem:[#allocation3 + $0x434] ss:$8 sps:$4 sm:$0xff]  }
  0x63   : > { %736 = vmatprep.subr.bf16.mxu0 %v2282_v46  ;;  %v2370_v46 = vld [vmem:[#allocation3 + $0x2f0] ss:$8 sps:$4 sm:$0xff]  }
  0x64   : > { %910 = vmatpush1.bf16.msra.mxu1 %v2289_v50  ;;  %v2377_v50 = vld [vmem:[#allocation3 + $0x380] ss:$8 sps:$4 sm:$0xff]  }
  0x65   : > { %911 = vmatprep.subr.bf16.mxu1 %v2297_v51  ;;  %v2375_v51 = vld [vmem:[#allocation3 + $0x324] ss:$8 sps:$4 sm:$0xff]  }
  0x66   : > { %737 = vmatpush1.bf16.msra.mxu0 %v2280_v48  ;;  %v2367_v48 = vld [vmem:[#allocation3 + $0x310] ss:$8 sps:$4 sm:$0xff]  }
  0x67   : > { %738 = vmatprep.subr.bf16.mxu0 %v2288_v49  ;;  %v1165_v49 = vor.u32 %v1164_v45, %v1160_v44 }
  0x68   : > { %912 = vmatpush1.bf16.msra.mxu1 %v2295_v54  ;;  %v2382_v54 = vld [vmem:[#allocation3 + $0x334] ss:$8 sps:$4 sm:$0xff]  }
  0x69   : > { %913 = vmatprep.subr.bf16.mxu1 %v2303_v55  ;;  %v2383_v55 = vld [vmem:[#allocation3 + $0x390] ss:$8 sps:$4 sm:$0xff]  }
  0x6a   : > { %739 = vmatpush1.bf16.msra.mxu0 %v2286_v52  ;;  %v2385_v52 = vld [vmem:[#allocation3 + $0x394] ss:$8 sps:$4 sm:$0xff]  }
  0x6b   : > { %740 = vmatprep.subr.bf16.mxu0 %v2294_v53  ;;  %v2373_v53 = vld [vmem:[#allocation3 + $0x320] ss:$8 sps:$4 sm:$0xff]  }
  0x6c   : > { %914 = vmatpush1.bf16.msra.mxu1 %v2301_v58  ;;  %v2389_v58 = vld [vmem:[#allocation3 + $0x3a0] ss:$8 sps:$4 sm:$0xff]  }
  0x6d   : > { %915 = vmatprep.subr.bf16.mxu1 %v2309_v59  ;;  %v2388_v59 = vld [vmem:[#allocation3 + $0x344] ss:$8 sps:$4 sm:$0xff]  }
  0x6e   : > { %741 = vmatpush1.bf16.msra.mxu0 %v2292_v56  ;;  %v2391_v56 = vld [vmem:[#allocation3 + $0x3a4] ss:$8 sps:$4 sm:$0xff]  }
  0x6f   : > { %742 = vmatprep.subr.bf16.mxu0 %v2300_v57  ;;  %v2380_v57 = vld [vmem:[#allocation3 + $0x330] ss:$8 sps:$4 sm:$0xff]  }
  0x70   : > { %916 = vmatpush1.bf16.msra.mxu1 %v2307_v62  ;;  %v2395_v62 = vld [vmem:[#allocation3 + $0x3b0] ss:$8 sps:$4 sm:$0xff]  }
  0x71   : > { %917 = vmatprep.subr.bf16.mxu1 %v2316_v63  ;;  %v2394_v63 = vld [vmem:[#allocation3 + $0x354] ss:$8 sps:$4 sm:$0xff]  }
  0x72   : > { %743 = vmatpush1.bf16.msra.mxu0 %v2298_v60  ;;  %v2397_v60 = vld [vmem:[#allocation3 + $0x3b4] ss:$8 sps:$4 sm:$0xff]  }
  0x73   : > { %744 = vmatprep.subr.bf16.mxu0 %v2306_v61  ;;  %v2386_v61 = vld [vmem:[#allocation3 + $0x340] ss:$8 sps:$4 sm:$0xff]  }
  0x74   : > { %918 = vmatpush1.bf16.msra.mxu1 %v2314_v3  ;;  %v2401_v3 = vld [vmem:[#allocation3 + $0x3c0] ss:$8 sps:$4 sm:$0xff]  }
  0x75   : > { %919 = vmatprep.subr.bf16.mxu1 %v2322_v4  ;;  %v2400_v4 = vld [vmem:[#allocation3 + $0x364] ss:$8 sps:$4 sm:$0xff]  }
  0x76   : > { %745 = vmatpush1.bf16.msra.mxu0 %v2304_v1  ;;  %v2403_v1 = vld [vmem:[#allocation3 + $0x3c4] ss:$8 sps:$4 sm:$0xff]  }
  0x77   : > { %1080 = vmatprep.subr.bf16.mxu0 %v2313_v2  ;;  %v2392_v2 = vld [vmem:[#allocation3 + $0x350] ss:$8 sps:$4 sm:$0xff]  }
  0x78   : > { %920 = vmatpush1.bf16.msra.mxu1 %v2320_v8  ;;  %v2407_v8 = vld [vmem:[#allocation3 + $0x3d0] ss:$8 sps:$4 sm:$0xff]  }
  0x79   : > { %763 = vmatmul.mubr.bf16.vlgmr.msra.gmra.mrb[4].mxu0 %v2310_v5  ;;  %1247 = vmatprep.subr.bf16.mxu1 %v2329_v9  ;;  %v2409_v5 = vld [vmem:[#allocation3 + $0x3d4] ss:$8 sps:$4 sm:$0xff]   ;;  %v1792_v9 = vld [vmem:[%s263_s12] sm:$0xff] }
  0x7a   : > { %1081 = vmatpush1.bf16.msra.mxu0 %v2311_v6  ;;  %1112 = vmatprep.mubr.bf16.mxu0 %v2564_v0  ;;  %v2426_v6 = vld [vmem:[%s2696_s8] sm:$0xfe]   ;;  %vm1794_vm0 = vcmp.gt.f32.partialorder %v1792_v9, 0.0 }
  0x7b   : > { %1082 = vmatprep.subr.bf16.mxu0 %v2319_v7  ;;  %938 = vmatmul.mubr.bf16.vlgmr.msra.gmra.mrb[4].mxu1 %v2326_v10  ;;  %v2398_v7 = vld [vmem:[#allocation3 + $0x360] ss:$8 sps:$4 sm:$0xff]   ;;  %v2406_v10 = vld [vmem:[#allocation3 + $0x374] ss:$8 sps:$4 sm:$0xff]  }
  0x7c   : > { %1248 = vmatpush1.bf16.msra.mxu1 %v2327_v12  ;;  %1279 = vmatprep.mubr.bf16.mxu1 %v2564_v0  ;;  %v1796_v12 = vsel %vm1794_vm0, 1, %v2564_v0 }
  0x7d   : > { %1249 = vmatprep.subr.bf16.mxu1 %v2335_v14  ;;  %v1488_v14 = vshrl.u32 %v2426_v6, 16  ;;  %1799 = vperm.xlu0 %2217, %v1796_v12  }
  0x7e   : > { %1083 = vmatpush1.bf16.msra.mxu0 %v2317_v11  ;;  %v2416_v11 = vld [vmem:[#allocation3 + $0x3e4] ss:$8 sps:$4 sm:$0xff]  }
  0x7f   : > { %1084 = vmatprep.subr.bf16.mxu0 %v2325_v13  ;;  %v2410_v13 = vld [vmem:[%s2696_s8] sm:$0xfe]  }
  0x80   : > { %1250 = vmatpush1.bf16.msra.mxu1 %v2333_v16  ;;  %v2404_v16 = vld [vmem:[#allocation3 + $0x370] ss:$8 sps:$4 sm:$0xff]  }
  0x81   : > { %1251 = vmatprep.subr.bf16.mxu1 %v2341_v18  ;;  %v2413_v18 = vld [vmem:[#allocation3 + $0x404] ss:$8 sps:$4 sm:$0xff]  }
  0x82   : > { %1085 = vmatpush1.bf16.msra.mxu0 %v2323_v15  ;;  %v1491_v15 = vshll.u32 %v2426_v6, 16 }
  0x83   : > { %1086 = vmatprep.subr.bf16.mxu0 %v2332_v17  ;;  %v2414_v17 = vld [vmem:[#allocation3 + $0x3e0] ss:$8 sps:$4 sm:$0xff]  }
  0x84   : > { %1252 = vmatpush1.bf16.msra.mxu1 %v2339_v20  ;;  %v1793_v20 = vld [vmem:[%s263_s12 + $0x8] sm:$0xff] }
  0x85   : > { %1253 = vmatprep.subr.bf16.mxu1 %v2347_v22  ;;  %vm1795_vm1 = vcmp.gt.f32.partialorder %v1793_v20, 0.0  ;;  %v1490_v22 = vrot.slane %v1488_v14, 1 }
  0x86   : > { %1087 = vmatpush1.bf16.msra.mxu0 %v2330_v19  ;;  %v2422_v19 = vld [vmem:[#allocation3 + $0x3f4] ss:$8 sps:$4 sm:$0xff]  }
  0x87   : > { %1088 = vmatprep.subr.bf16.mxu0 %v2338_v21  ;;  %v1326_v21 = vrot.slane %v2410_v13, 1 }
  0x88   : > { %1254 = vmatpush1.bf16.msra.mxu1 %v2345_v24  ;;  %v1797_v24 = vsel %vm1795_vm1, 1, %v2564_v0 }
  0x89   : > { %1255 = vmatprep.subr.bf16.mxu1 %v2353_v26  ;;  %v2420_v26 = vld [vmem:[#allocation3 + $0x3f0] ss:$8 sps:$4 sm:$0xff]   ;;  %1802 = vperm.xlu0 %2217, %v1797_v24  }
  0x8a   : > { %1089 = vmatpush1.bf16.msra.mxu0 %v2336_v23  ;;  %v1493_v23 = vrot.slane %v1491_v15, 2 }
  0x8b   : > { %1090 = vmatprep.subr.bf16.mxu0 %v2344_v25  ;;  %v2411_v25 = vld [vmem:[#allocation3 + $0x400] ss:$8 sps:$4 sm:$0xff]  }
  0x8c   : > { %1256 = vmatpush1.bf16.msra.mxu1 %v2351_v28  ;;  %v1494_v28 = vor.u32 %v1493_v23, %v1490_v22 }
  0x8d   : > { %1257 = vmatprep.subr.bf16.mxu1 %v2359_v30  ;;  %v2425_v30 = vld [vmem:[#allocation3 + $0x424] ss:$8 sps:$4 sm:$0xff]  }
  0x8e   : > { %1091 = vmatpush1.bf16.msra.mxu0 %v2342_v27  ;;  %v2419_v27 = vld [vmem:[#allocation3 + $0x414] ss:$8 sps:$4 sm:$0xff]  }
  0x8f   : > { %1092 = vmatprep.subr.bf16.mxu0 %v2350_v29  ;;  %v2417_v29 = vld [vmem:[#allocation3 + $0x410] ss:$8 sps:$4 sm:$0xff]  }
  0x90   : > { %1258 = vmatpush1.bf16.msra.mxu1 %v2357_v33  ;;  %v2427_v33 = vld [vmem:[#allocation3 + $0x430] ss:$8 sps:$4 sm:$0xff]  }
  0x91   : > { %1259 = vmatprep.subr.bf16.mxu1 %v2366_v35  ;;  %v2430_v35 = vld [vmem:[#allocation3 + $0x440] ss:$8 sps:$4 sm:$0xff]  }
  0x92   : > { %1093 = vmatpush1.bf16.msra.mxu0 %v2348_v31  ;;  %v2423_v31 = vld [vmem:[#allocation3 + $0x420] ss:$8 sps:$4 sm:$0xff]  }
  0x93   : > { %1094 = vmatprep.subr.bf16.mxu0 %v2356_v34  ;;  %v2432_v34 = vld [vmem:[#allocation3 + $0x444] ss:$8 sps:$4 sm:$0xff]  }
  0x94   : > { %1260 = vmatpush1.bf16.msra.mxu1 %v2364_v39  ;;  %v2441_v39 = vld [vmem:[#allocation3 + $0x474] ss:$8 sps:$4 sm:$0xff]  }
  0x95   : > { %1261 = vmatprep.subr.bf16.mxu1 %v2372_v40  ;;  %v2442_v40 = vld [vmem:[%s2696_s8] sm:$0xfc]   ;;  %s2477_s8 = scalar_lea.vmem %s2732_s5, 32 }
  0x96   : > { %1095 = vmatpush1.bf16.msra.mxu0 %v2354_v36  ;;  %v2435_v36 = vld [vmem:[#allocation3 + $0x454] ss:$8 sps:$4 sm:$0xff]   ;;  %p2478_p8 = scmp.ne.s32.totalorder %s2732_s5, %s2477_s8  ;;  %p2485_p3 = scmp.lt.s32.totalorder %s2483_s10, %s2477_s8 }
  0x97   : > { %1408 = vmatprep.subr.bf16.mxu0 %v2363_v37  ;;  %v2433_v37 = vld [vmem:[#allocation3 + $0x450] ss:$8 sps:$4 sm:$0xff]  }
  0x98   : > { %1262 = vmatpush1.bf16.msra.mxu1 %v2370_v46  ;;  %v275_v46 = vld [vmem:[#allocation2 + $0x8] sm:$0xf0]  ;;  %p2479_p11 = pnand %p2478_p8, %p2794_p10  ;;  %p2486_p5 = por %p2485_p3, %p2484_p1 }
  0x99   : > { %1113 = vmatmul.mubr.bf16.vlgmr.msra.gmra.mrb[8].mxu0 %v2360_v42  ;;  %1576 = vmatprep.subr.bf16.mxu1 %v2379_v47  ;;  %v1655_v42 = vrot.slane %v2442_v40, 2 }
  0x9a   : > { %1409 = vmatpush1.bf16.msra.mxu0 %v2361_v41  ;;  %1440 = vmatprep.mubr.bf16.mxu0 %v2564_v0  ;;  %v2439_v41 = vld [vmem:[#allocation3 + $0x470] ss:$8 sps:$4 sm:$0xff]   ;;  %p2480_p13 = pneg %p2479_p11 }
  0x9b   : > { %1410 = vmatprep.subr.bf16.mxu0 %v2369_v43  ;;  %1280 = vmatmul.mubr.bf16.vlgmr.msra.gmra.mrb[8].mxu1 %v1165_v49  ;;  %v274_v43 = vld [vmem:[#allocation2] sm:$0xf0] }
  0x9c   : > { %1577 = vmatpush1.bf16.msra.mxu1 %v2377_v50  ;;  %1608 = vmatprep.mubr.bf16.mxu1 %v2564_v0  ;;  %p2487_p6 = pnand %p2486_p5, %p2480_p13 }
  0x9d   : > { %1578 = vmatprep.subr.bf16.mxu1 %v2385_v52 }
  0x9e   : > { %1411 = vmatpush1.bf16.msra.mxu0 %v2367_v48 }
  0x9f   : > { %1412 = vmatprep.subr.bf16.mxu0 %v2375_v51 }
  0xa0   : > { %1579 = vmatpush1.bf16.msra.mxu1 %v2383_v55 }
  0xa1   : > { %1580 = vmatprep.subr.bf16.mxu1 %v2391_v56 }
  0xa2   : > { %1413 = vmatpush1.bf16.msra.mxu0 %v2373_v53 }
  0xa3   : > { %1414 = vmatprep.subr.bf16.mxu0 %v2382_v54 }
  0xa4   : > { %1581 = vmatpush1.bf16.msra.mxu1 %v2389_v58 }
  0xa5   : > { %1582 = vmatprep.subr.bf16.mxu1 %v2397_v60 }
  0xa6   : > { %1415 = vmatpush1.bf16.msra.mxu0 %v2380_v57 }
  0xa7   : > { %1416 = vmatprep.subr.bf16.mxu0 %v2388_v59 }
  0xa8   : > { %1583 = vmatpush1.bf16.msra.mxu1 %v2395_v62 }
  0xa9   : > { %1584 = vmatprep.subr.bf16.mxu1 %v2403_v1 }
  0xaa   : > { %1417 = vmatpush1.bf16.msra.mxu0 %v2386_v61 }
  0xab   : > { %1418 = vmatprep.subr.bf16.mxu0 %v2394_v63 }
  0xac   : > { %1585 = vmatpush1.bf16.msra.mxu1 %v2401_v3 }
  0xad   : > { %1586 = vmatprep.subr.bf16.mxu1 %v2409_v5 }
  0xae   : > { %1419 = vmatpush1.bf16.msra.mxu0 %v2392_v2 }
  0xaf   : > { %1420 = vmatprep.subr.bf16.mxu0 %v2400_v4 }
  0xb0   : > { %1587 = vmatpush1.bf16.msra.mxu1 %v2407_v8 }
  0xb1   : > { %1588 = vmatprep.subr.bf16.mxu1 %v2416_v11 }
  0xb2   : > { %1421 = vmatpush1.bf16.msra.mxu0 %v2398_v7 }
  0xb3   : > { %1422 = vmatprep.subr.bf16.mxu0 %v2406_v10 }
  0xb4   : > { %1589 = vmatpush1.bf16.msra.mxu1 %v2414_v17 }
  0xb5   : > { %1590 = vmatprep.subr.bf16.mxu1 %v2422_v19 }
  0xb6   : > { %1423 = vmatpush1.bf16.msra.mxu0 %v2404_v16 }
  0xb7   : > { %1737 = vmatprep.subr.bf16.mxu0 %v2413_v18 }
  0xb8   : > { %1591 = vmatpush1.bf16.msra.mxu1 %v2420_v26 }
  0xb9   : > { %1441 = vmatmul.mubr.bf16.vlgmr.msra.gmra.mrb[12].mxu0 %v1326_v21 }
  0xba   : > { %1738 = vmatpush1.bf16.msra.mxu0 %v2411_v25  ;;  %1769 = vmatprep.mubr.bf16.mxu0 %v2564_v0  ;;  %v2436_v0 = vld [vmem:[#allocation3 + $0x460] ss:$8 sps:$4 sm:$0xff]  }
  0xbb   : > { %1739 = vmatprep.subr.bf16.mxu0 %v2419_v27  ;;  %1609 = vmatmul.mubr.bf16.vlgmr.msra.gmra.mrb[12].mxu1 %v1494_v28 }
  0xbe   : > { %1740 = vmatpush1.bf16.msra.mxu0 %v2417_v29 }
  0xbf   : > { %1741 = vmatprep.subr.bf16.mxu0 %v2425_v30 }
  0xc2   : > { %1742 = vmatpush1.bf16.msra.mxu0 %v2423_v31 }
  0xc3   : > { %1743 = vmatprep.subr.bf16.mxu0 %v2429_v32 }
  0xc6   : > { %1744 = vmatpush1.bf16.msra.mxu0 %v2427_v33 }
  0xc7   : > { %1745 = vmatprep.subr.bf16.mxu0 %v2432_v34 }
  0xca   : > { %1746 = vmatpush1.bf16.msra.mxu0 %v2430_v35 }
  0xcb   : > { %1747 = vmatprep.subr.bf16.mxu0 %v2435_v36 }
  0xce   : > { %1748 = vmatpush1.bf16.msra.mxu0 %v2433_v37 }
  0xcf   : > { %1749 = vmatprep.subr.bf16.mxu0 %v2438_v38 }
  0xd2   : > { %1750 = vmatpush1.bf16.msra.mxu0 %v2436_v0 }
  0xd3   : > { %1751 = vmatprep.subr.bf16.mxu0 %v2441_v39 }
  0xd6   : > { %1752 = vmatpush1.bf16.msra.mxu0 %v2439_v41 }
  0xd9   : > { %1770 = vmatmul.mubr.bf16.vlgmr.msra.gmra.mrb[16].mxu0 %v1655_v42 }
 0x12c   : > { %v414_v44 = vpop.f32.mrb[0].mxu0 }
 0x12d   : > { %v428_v45 = vrot.slane %v414_v44, 4  ;;  %v416_v47 = vpop.f32.mrb[1].mxu0 }
 0x12e   : > { %v429_v48 = vrot.slane %v416_v47, 4  ;;  %v418_v49 = vpop.f32.mrb[2].mxu0  ;;  %v589_v55 = vpop.f32.mrb[0].mxu1 }
 0x12f   : > { %v438_v50 = vadd.f32 %v428_v45, %v274_v43  ;;  %v430_v51 = vrot.slane %v418_v49, 4  ;;  %v420_v52 = vpop.f32.mrb[3].mxu0  ;;  %v603_v57 = vrot.slane %v589_v55, 5  ;;  %v591_v58 = vpop.f32.mrb[1].mxu1 }
 0x130   : > { %v439_v53 = vadd.f32 %v429_v48, %v275_v46  ;;  %v432_v54 = vrot.slane %v420_v52, 4  ;;  %v604_v60 = vrot.slane %v591_v58, 5  ;;  %v593_v61 = vpop.f32.mrb[2].mxu1 }
 0x131   : > { %442 = vst [vmem:[#allocation2] sm:$0xf0] %v438_v50  ;;  %v431_v56 = vsel %vm427_vm2, %v428_v45, %v430_v51  ;;  %v605_v62 = vrot.slane %v593_v61, 5  ;;  %v595_v63 = vpop.f32.mrb[3].mxu1 }
 0x132   : > { %443 = vst [vmem:[#allocation2 + $0x8] sm:$0xf0] %v439_v53  ;;  %v433_v59 = vsel %vm427_vm2, %v429_v48, %v432_v54  ;;  %v607_v1 = vrot.slane %v595_v63, 5 }
 0x133   : > { %v606_v2 = vsel %vm602_vm3, %v603_v57, %v605_v62 }
 0x134   : > { %v615_v3 = vadd.f32 %v606_v2, %v431_v56  ;;  %v608_v4 = vsel %vm602_vm3, %v604_v60, %v607_v1 }
 0x135   : > { %v616_v5 = vadd.f32 %v608_v4, %v433_v59 }
 0x138   : > { %v448_v6 = vld [vmem:[#allocation2] sm:$0xf8] }
 0x139   : > { %v613_v7 = vadd.f32 %v603_v57, %v448_v6  ;;  %v449_v8 = vld [vmem:[#allocation2 + $0x8] sm:$0xf8] }
 0x13a   : > { %v614_v9 = vadd.f32 %v604_v60, %v449_v8 }
 0x13b   : > { %617 = vst [vmem:[#allocation2] sm:$0xf8] %v613_v7 }
 0x13c   : > { %618 = vst [vmem:[#allocation2 + $0x8] sm:$0xf8] %v614_v9 }
 0x142   : > { %v623_v13 = vld [vmem:[#allocation2] sm:$0xfc] }
 0x143   : > { %v624_v17 = vld [vmem:[#allocation2 + $0x8] sm:$0xfc] }
 0x14c   : > { %v764_v10 = vpop.f32.mrb[4].mxu0 }
 0x14d   : > { %v778_v11 = vrot.slane %v764_v10, 6  ;;  %v766_v12 = vpop.f32.mrb[5].mxu0 }
 0x14e   : > { %v779_v14 = vrot.slane %v766_v12, 6  ;;  %v768_v15 = vpop.f32.mrb[6].mxu0  ;;  %v939_v22 = vpop.f32.mrb[4].mxu1 }
 0x14f   : > { %v788_v16 = vadd.f32 %v778_v11, %v623_v13  ;;  %v780_v18 = vrot.slane %v768_v15, 6  ;;  %v770_v19 = vpop.f32.mrb[7].mxu0  ;;  %v953_v24 = vrot.slane %v939_v22, 7  ;;  %v941_v25 = vpop.f32.mrb[5].mxu1 }
 0x150   : > { %v789_v20 = vadd.f32 %v779_v14, %v624_v17  ;;  %v782_v21 = vrot.slane %v770_v19, 6  ;;  %v954_v28 = vrot.slane %v941_v25, 7  ;;  %v943_v29 = vpop.f32.mrb[6].mxu1 }
 0x151   : > { %792 = vst [vmem:[#allocation2] sm:$0xfc] %v788_v16  ;;  %v781_v23 = vsel %vm777_vm4, %v778_v11, %v780_v18  ;;  %v955_v31 = vrot.slane %v943_v29, 7  ;;  %v945_v32 = vpop.f32.mrb[7].mxu1 }
 0x152   : > { %793 = vst [vmem:[#allocation2 + $0x8] sm:$0xfc] %v789_v20  ;;  %v790_v26 = vadd.f32 %v781_v23, %v615_v3  ;;  %v783_v27 = vsel %vm777_vm4, %v779_v14, %v782_v21  ;;  %v957_v33 = vrot.slane %v945_v32, 7 }
 0x153   : > { %v791_v30 = vadd.f32 %v783_v27, %v616_v5  ;;  %v956_v34 = vsel %vm952_vm5, %v953_v24, %v955_v31 }
 0x154   : > { %v965_v35 = vadd.f32 %v956_v34, %v790_v26  ;;  %v958_v36 = vsel %vm952_vm5, %v954_v28, %v957_v33 }
 0x155   : > { %v966_v37 = vadd.f32 %v958_v36, %v791_v30 }
 0x158   : > { %v798_v38 = vld [vmem:[#allocation2] sm:$0xfe] }
 0x159   : > { %v963_v0 = vadd.f32 %v953_v24, %v798_v38  ;;  %v799_v39 = vld [vmem:[#allocation2 + $0x8] sm:$0xfe] }
 0x15a   : > { %v964_v40 = vadd.f32 %v954_v28, %v799_v39  ;;  %v1800_v28 = vpop.permute.xlu0 %1799 }
 0x15b   : > { %967 = vst [vmem:[#allocation2] sm:$0xfe] %v963_v0  ;;  %vm1804_vm6 = vcmp.eq.s32.totalorder %v1800_v28, 1 }
 0x15c   : > { %968 = vst [vmem:[#allocation2 + $0x8] sm:$0xfe] %v964_v40 }
 0x15e   : > { %v1803_v29 = vpop.permute.xlu0 %1802 }
 0x15f   : > { %vm1805_vm7 = vcmp.eq.s32.totalorder %v1803_v29, 1 }
 0x162   : > { %v973_v41 = vld [vmem:[#allocation2] sm:$0xff] }
 0x163   : > { %v974_v44 = vld [vmem:[#allocation2 + $0x8] sm:$0xff] }
 0x16c   : > { %v1114_v42 = vpop.f32.mrb[8].mxu0 }
 0x16d   : > { %v1123_v43 = vadd.f32 %v1114_v42, %v973_v41  ;;  %v1116_v45 = vpop.f32.mrb[9].mxu0 }
 0x16e   : > { %v1124_v46 = vadd.f32 %v1116_v45, %v974_v44  ;;  %v1118_v47 = vpop.f32.mrb[10].mxu0  ;;  %v1281_v51 = vpop.f32.mrb[8].mxu1 }
 0x16f   : > { %v1125_v48 = vadd.f32 %v1118_v47, %v965_v35  ;;  %v1120_v49 = vpop.f32.mrb[11].mxu0  ;;  %v1290_v52 = vadd.f32 %v1281_v51, %v1123_v43  ;;  %v1283_v53 = vpop.f32.mrb[9].mxu1 }
 0x170   : > { %v1126_v50 = vadd.f32 %v1120_v49, %v966_v37  ;;  %v1291_v54 = vadd.f32 %v1283_v53, %v1124_v46  ;;  %v1285_v55 = vpop.f32.mrb[10].mxu1 }
 0x171   : > { %1129 = vst [vmem:[#allocation2 + $0x10] sm:$0xff] %v1125_v48  ;;  %v1287_v56 = vpop.f32.mrb[11].mxu1 }
 0x172   : > { %1130 = vst [vmem:[#allocation2 + $0x18] sm:$0xff] %v1126_v50 }
 0x178   : > { %v1135_v57 = vld [vmem:[#allocation2 + $0x10] sm:$0x7f] }
 0x179   : > { %v1292_v58 = vadd.f32 %v1285_v55, %v1135_v57  ;;  %v1136_v59 = vld [vmem:[#allocation2 + $0x18] sm:$0x7f] }
 0x17a   : > { %v1293_v60 = vadd.f32 %v1287_v56, %v1136_v59 }
 0x17b   : > { %1296 = vst [vmem:[#allocation2 + $0x10] sm:$0x7f] %v1292_v58 }
 0x17c   : > { %1297 = vst [vmem:[#allocation2 + $0x18] sm:$0x7f] %v1293_v60 }
 0x182   : > { %v1302_v2 = vld [vmem:[#allocation2 + $0x10] sm:$0x3f] }
 0x183   : > { %v1303_v5 = vld [vmem:[#allocation2 + $0x18] sm:$0x3f] }
 0x18c   : > { %v1442_v61 = vpop.f32.mrb[12].mxu0 }
 0x18d   : > { %v1451_v62 = vadd.f32 %v1442_v61, %v1290_v52  ;;  %v1444_v63 = vpop.f32.mrb[13].mxu0 }
 0x18e   : > { %v1452_v1 = vadd.f32 %v1444_v63, %v1291_v54  ;;  %v1446_v3 = vpop.f32.mrb[14].mxu0  ;;  %v1610_v8 = vpop.f32.mrb[12].mxu1 }
 0x18f   : > { %v1453_v4 = vadd.f32 %v1446_v3, %v1302_v2  ;;  %v1448_v6 = vpop.f32.mrb[15].mxu0  ;;  %v1619_v9 = vadd.f32 %v1610_v8, %v1451_v62  ;;  %v1612_v10 = vpop.f32.mrb[13].mxu1 }
 0x190   : > { %v1454_v7 = vadd.f32 %v1448_v6, %v1303_v5  ;;  %v1620_v11 = vadd.f32 %v1612_v10, %v1452_v1  ;;  %v1614_v12 = vpop.f32.mrb[14].mxu1  ;;  %v1837_v5 = vld [vmem:[%s2781_s3] sm:$0x1] }
 0x191   : > { %1457 = vst [vmem:[#allocation2 + $0x10] sm:$0x3f] %v1453_v4  ;;  %v1616_v13 = vpop.f32.mrb[15].mxu1 }
 0x192   : > { %1458 = vst [vmem:[#allocation2 + $0x18] sm:$0x3f] %v1454_v7 }
 0x198   : > { %v1463_v14 = vld [vmem:[#allocation2 + $0x10] sm:$0x1f] }
 0x199   : > { %v1621_v15 = vadd.f32 %v1614_v12, %v1463_v14  ;;  %v1464_v16 = vld [vmem:[#allocation2 + $0x18] sm:$0x1f] }
 0x19a   : > { %v1622_v17 = vadd.f32 %v1616_v13, %v1464_v16 }
 0x19b   : > { %1625 = vst [vmem:[#allocation2 + $0x10] sm:$0x1f] %v1621_v15 }
 0x19c   : > { %1626 = vst [vmem:[#allocation2 + $0x18] sm:$0x1f] %v1622_v17 }
 0x1a2   : > { %v1631_v22 = vld [vmem:[#allocation2 + $0x10] sm:$0xf] }
 0x1a3   : > { %v1632_v25 = vld [vmem:[#allocation2 + $0x18] sm:$0xf] }
 0x1ac   : > { %v1771_v18 = vpop.f32.mrb[16].mxu0 }
 0x1ad   : > { %v1780_v19 = vadd.f32 %v1771_v18, %v1619_v9  ;;  %v1773_v20 = vpop.f32.mrb[17].mxu0 }
 0x1ae   : > { %v1781_v21 = vadd.f32 %v1773_v20, %v1620_v11  ;;  %v1775_v23 = vpop.f32.mrb[18].mxu0 }
 0x1af   : > { %1784 = vst [vmem:[#allocation2] sm:$0xff] %v1780_v19  ;;  %v1782_v24 = vadd.f32 %v1775_v23, %v1631_v22  ;;  %v1777_v26 = vpop.f32.mrb[19].mxu0 }
 0x1b0   : > { %1785 = vst [vmem:[#allocation2 + $0x8] sm:$0xff] %v1781_v21  ;;  %v1783_v27 = vadd.f32 %v1777_v26, %v1632_v25  ;;  %v1806_v31 = vsel %vm1804_vm6, %v1781_v21, -1e+09 }
 0x1b1   : > { %1786 = vst [vmem:[#allocation2 + $0x10] sm:$0xf] %v1782_v24 }
 0x1b2   : > { %1787 = vst [vmem:[#allocation2 + $0x18] sm:$0xf] %v1783_v27 }
 0x1b8   : > { %v1789_v43 = vld [vmem:[#allocation2 + $0x10] sm:$0xff] }
 0x1b9   : > { %v1791_v30 = vld [vmem:[#allocation2 + $0x18] sm:$0xff]  ;;  %v1841_v44 = vmax.f32 %v1780_v19, %v1789_v43 }
 0x1ba   : > { %v1807_v32 = vsel %vm1805_vm7, %v1791_v30, -1e+09 }
 0x1bb   : > { %v1808_v33 = vmax.f32 %v1806_v31, %v1807_v32  ;;  %v1842_v48 = vrot.slane %v1841_v44, 4 }
 0x1bd   : > { %v1809_v34 = vrot.slane %v1808_v33, 4  ;;  %v1843_v53 = vmax.f32 %v1841_v44, %v1842_v48 }
 0x1bf   : > { %v1810_v35 = vmax.f32 %v1808_v33, %v1809_v34  ;;  %v1844_v58 = vrot.slane %v1843_v53, 2 }
 0x1c1   : > { %v1811_v36 = vrot.slane %v1810_v35, 2  ;;  %v1845_v62 = vmax.f32 %v1843_v53, %v1844_v58 }
 0x1c3   : > { %v1812_v37 = vmax.f32 %v1810_v35, %v1811_v36  ;;  %v1846_v2 = vrot.slane %v1845_v62, 1 }
 0x1c5   : > { %v1813_v38 = vrot.slane %v1812_v37, 1  ;;  %v1847_v4 = vmax.f32 %v1845_v62, %v1846_v2 }
 0x1c7   : > { %v1814_v0 = vmax.f32 %v1812_v37, %v1813_v38  ;;  %v1848_v7 = vadd.f32 %v1847_v4, %v1837_v5 }
 0x1c9   : > { %v1815_v39 = vsub.f32 %v1806_v31, %v1814_v0  ;;  %v1816_v40 = vsub.f32 %v1807_v32, %v1814_v0  ;;  %v1850_v11 = vrot.slane %v1848_v7, 7 }
 0x1cb   : > { %v1817_v41 = vmul.f32 1.442695, %v1815_v39  ;;  %v1819_v42 = vmul.f32 1.442695, %v1816_v40 }
 0x1cd   : > { %2443 = vpow2.f32 %v1817_v41 }
 0x1ce   : > { %2445 = vpow2.f32 %v1819_v42 }
 0x1d7   : > { %v2444_v45 = vpop.eup %2443 }
 0x1d8   : > { %v2446_v46 = vpop.eup %2445  ;;  %v1821_v47 = vmul.f32 %v2444_v45, %v1780_v19 }
 0x1d9   : > { %v1822_v49 = vmul.f32 %v2446_v46, %v1789_v43  ;;  %v1830_v50 = vadd.f32 %v2446_v46, %v2444_v45 }
 0x1db   : > { %v1823_v51 = vadd.f32 %v1822_v49, %v1821_v47  ;;  %v1831_v52 = vrot.slane %v1830_v50, 4 }
 0x1dd   : > { %v1824_v54 = vrot.slane %v1823_v51, 4  ;;  %v1832_v55 = vadd.f32 %v1831_v52, %v1830_v50 }
 0x1df   : > { %v1833_v56 = vrot.slane %v1832_v55, 2  ;;  %v1825_v57 = vadd.f32 %v1824_v54, %v1823_v51 }
 0x1e1   : > { %v1834_v59 = vadd.f32 %v1833_v56, %v1832_v55  ;;  %v1826_v61 = vrot.slane %v1825_v57, 2 }
 0x1e3   : > { %v1835_v60 = vrot.slane %v1834_v59, 1  ;;  %v1827_v1 = vadd.f32 %v1826_v61, %v1825_v57 }
 0x1e5   : > { %v1836_v63 = vadd.f32 %v1835_v60, %v1834_v59  ;;  %v1828_v3 = vrot.slane %v1827_v1, 1 }
 0x1e7   : > { %2447 = vrcp.f32 %v1836_v63  ;;  %v1829_v6 = vadd.f32 %v1828_v3, %v1827_v1 }
 0x1f1   : > { %v2448_v8 = vpop.eup %2447 }
 0x1f2   : > { %v1839_v9 = vmul.f32 %v2448_v8, %v1829_v6 }
 0x1f4   : > { %v1840_v10 = vadd.f32 %v1839_v9, %v1837_v5 }
 0x1f6   : > { %v1852_v12 = vsel %vm952_vm5, %v1840_v10, %v1850_v11 }
 0x1f7   : > { %1853 = vst [vmem:[%s253_s26] sm:$0x3] %v1852_v12 }
 0x1f8   : > { %2490 = shalt.err (!%p2487_p6)
}
 0x1f9   : > { %s2491_s11 = scalar_lea.hbm %s2730_s6, 32  ;;  %s2495_s14 = scalar_lea.hbm %s2782_s4, 64 }
 0x1fa   : > { %p2492_p7 = scmp.ne.s32.totalorder %s2730_s6, %s2491_s11  ;;  %p2496_p0 = scmp.lt.u32.totalorder %s2730_s6, %s2782_s4 }
 0x1fb   : > { %p2497_p2 = scmp.lt.u32.totalorder %s2495_s14, %s2491_s11  ;;  %p2499_p8 = scmp.lt.u32.totalorder %s2491_s11, %s2730_s6 }
 0x1fc   : > { %p2493_p9 = pnand %p2492_p7, %p2794_p10 }
 0x1fd   : > { %p2498_p4 = por %p2497_p2, %p2496_p0 }
 0x1fe   : > { %p2494_p12 = pneg %p2493_p9 }
 0x1ff   : > { %p2500_p11 = por %p2499_p8, %p2498_p4 }
 0x201   : > { %p2501_p13 = pnand %p2500_p11, %p2494_p12 }
 0x203   : > { %2504 = shalt.err (!%p2501_p13)
}
 0x204   : > { %2151 = dma.vmem_to_hbm [thread:$0]  (%p2794_p10), %s2732_s5, 32, %s2730_s6, %s1855_s7  }
 0x205 PF: > { %p2163_p1 = scmp.ge.s32.totalorder %s2559_s20, 2  ;;  %s1881_s24 = sand.u32 1, %s2539_s15  }
 0x206   : > { %p2795_p3 = scmp.ne.s32.totalorder %s2788_s27, 0  ;;  %s1882_s26 = scalar_lea.sflag [#allocation5], %s1881_s24 }
 0x208   : > { %p2158_p5 = pnand %p2163_p1, %p2795_p3 }
 0x20a   : > { %2534 = dma.done.wait (!%p2158_p5), %s1882_s26, 32  }
 0x20b   : > { %2536 = vsyncadd (!%p2158_p5), %s1882_s26, 4294967264  ;;  %s18_s20 = sadd.s32 1, %s2559_s20   ;;  %s2796_s15 = smov %s2543_s16 }
 0x20c   : > { %p15_p6 = scmp.ge.s32.totalorder %s18_s20, 4   ;;  %s2797_s16 = smov %s2547_s17 }
 0x20d   : > { %s2798_s17 = smov %s2645_s28  ;;  %s2799_s18 = smov %s2555_s19 }
 0x20e   : > { %s2800_s19 = smov %s2802_s23  ;;  %17 = sbr.rel (!%p15_p6) target bundleno = 5 (0x5), region = 91 }
 0x215   :  { %1887 = vsyncpa [#allocation4], 1 }
 0x216   :  { %1889 = vsyncpa [#allocation4 + $0x1], 1 }
 0x217   :  { %1890 = vsyncpa [#allocation5], 1 }
 0x218   :  { %1892 = vsyncpa [#allocation5 + $0x1], 1 }

</bundles_post_ra>
